<compile_context>
chip_gen: v5e
topology: v5e:2x2
jax: 0.10.0
libtpu: 0.0.40
codegen_flags: <defaults>
</compile_context>

<pallas_src>
import math
import functools

import jax
import jax.numpy as jnp
import numpy as np
from jax.experimental import pallas as pl
from jax.experimental.pallas import tpu as pltpu


def _round_up(x, m):
    return ((x + m - 1) // m) * m


def _pick_batch_block(n, hw, target_rows=256):
    """Largest divisor of n such that block_rows = b*hw <= target_rows (>=1)."""
    best = 1
    for b in range(1, n + 1):
        if n % b == 0 and b * hw <= target_rows:
            best = b
    return best


def _pick_k_tile(dfc, max_tk=1024):
    """Largest multiple of 128 that divides dfc and is <= max_tk (else dfc)."""
    best = None
    t = 128
    while t <= min(dfc, max_tk):
        if dfc % t == 0:
            best = t
        t += 128
    return best if best is not None else dfc


# -----------------------------------------------------------------------------
# Kernel 1: fused [mbstd-channel concat + zero pad + 3x3 equalized conv
#                  + bias + act_gain + leaky_relu(0.2)]
# -----------------------------------------------------------------------------
def conv3x3_kernel(x_ref, feat_ref, w_ref, b_ref, o_ref, xpad_ref, *,
                   B, H, W, C, F, Cpad, Cout, act_gain):
    # x_ref   : [B, H, W, C]      activation block (NHWC), matmul dtype
    # feat_ref: [N, F]            per-sample minibatch-std features (f32)
    # w_ref   : [9, Cpad, Cout]   tap-major weights; eq-lr gain folded,
    #                             rows C+F..Cpad are zero
    # b_ref   : [1, Cout]         bias (f32)
    # o_ref   : [B*H*W, Cout]     NHWC-flat output rows (b, h, w)
    # xpad_ref: VMEM scratch [B, H+2, W+2, Cpad]
    nb = pl.program_id(0)

    # Build the zero-padded, std-channel-augmented input tile in VMEM.
    # (Re-zero every step: border + channel padding must be zero, and the
    #  scratch is per-core under "parallel" grid sharding.)
    xpad_ref[...] = jnp.zeros_like(xpad_ref)
    feat = feat_ref[pl.ds(nb * B, B), :].astype(xpad_ref.dtype)         # [B, F]
    xin = jnp.concatenate(
        [x_ref[...].astype(xpad_ref.dtype),
         jnp.broadcast_to(feat[:, None, None, :], (B, H, W, F))],
        axis=-1)                                                        # [B,H,W,C+F]
    xpad_ref[:, 1:H + 1, 1:W + 1, :C + F] = xin

    # 9-tap matmul accumulation: M = B*H*W, K = Cpad, N = Cout, f32 accum.
    # NOTE: for production-scale Cout (>=512) tile Cout here so the live f32
    # accumulator stays inside the vreg budget.
    acc = jnp.zeros((B * H * W, Cout), jnp.float32)
    for dy in range(3):
        for dx in range(3):
            patch = xpad_ref[:, dy:dy + H, dx:dx + W, :]                # [B,H,W,Cpad]
            acc = acc + jnp.dot(patch.reshape(B * H * W, Cpad),
                                w_ref[dy * 3 + dx],
                                preferred_element_type=jnp.float32)

    y = (acc + b_ref[...]) * act_gain
    y = jnp.where(y >= 0.0, y, 0.2 * y)                                 # leaky_relu(0.2)
    o_ref[...] = y.astype(o_ref.dtype)


# -----------------------------------------------------------------------------
# Kernel 2: fused head = fc (K-tiled) + leaky_relu + out linear + cmap project
# -----------------------------------------------------------------------------
def head_kernel(h_ref, wfc_ref, bfc_ref, wout_ref, bout_ref, cmap_ref, o_ref,
                acc_ref, *, cmap_dim, act_gain):
    # h_ref   : [N, tk]        NHWC-flat conv activations (K tile)
    # wfc_ref : [tk, Cfc]      fc weight K tile (rows permuted to NHWC order)
    # acc_ref : [N, Cfc]       f32 VMEM accumulator
    k = pl.program_id(0)

    @pl.when(k == 0)
    def _():
        acc_ref[...] = jnp.zeros_like(acc_ref)

    acc_ref[...] += jnp.dot(h_ref[...], wfc_ref[...],
                            preferred_element_type=jnp.float32)

    @pl.when(k == pl.num_programs(0) - 1)
    def _():
        z = (acc_ref[...] + bfc_ref[...]) * act_gain
        z = jnp.where(z >= 0.0, z, 0.2 * z)                             # leaky_relu(0.2)
        u = jnp.dot(z, wout_ref[...],
                    preferred_element_type=jnp.float32) + bout_ref[...]
        s = jnp.sum(u * cmap_ref[...], axis=1, keepdims=True)
        o_ref[...] = s * (1.0 / math.sqrt(cmap_dim))


# -----------------------------------------------------------------------------
# minibatch-std statistic (plain JAX, per review) — matches torch semantics.
# -----------------------------------------------------------------------------
def minibatch_std_feature(x_nchw, group_size, num_channels):
    N, C, H, W = x_nchw.shape
    ng, f = group_size, num_channels
    y = x_nchw.reshape(ng, N // ng, f, C // f, H, W)
    y = y - y.mean(axis=0)
    y = jnp.sqrt((y * y).mean(axis=0) + 1e-8)
    y = y.mean(axis=(2, 3, 4))                       # [N//ng, f]
    return jnp.tile(y, (ng, 1))                      # [N, f]  (== torch .repeat)


# -----------------------------------------------------------------------------
# Wrapper
# -----------------------------------------------------------------------------
def discriminator_output_forward(x_nchw, cmap, params, *,
                                 group_size=2, mbstd_channels=1,
                                 matmul_dtype=jnp.bfloat16,
                                 conv_rows_target=256, head_k_tile_max=1024):
    N, C, H, W = x_nchw.shape
    cmap_dim = cmap.shape[1]
    # TODO(synk): mbstd_num_channels == 0 (module's mbstd=None configuration) not wired up.
    assert mbstd_channels >= 1
    assert N % group_size == 0, "batch must be divisible by mbstd group_size"
    assert C % mbstd_channels == 0

    F = mbstd_channels
    Cin1 = C + F
    Cpad = _round_up(Cin1, 128)                      # lane-pad contraction dim
    Cout = params["conv_w"].shape[0]

    # ---- minibatch-std feature (tiny; plain JAX) ----
    feat = minibatch_std_feature(x_nchw, group_size, F)                 # [N, F] f32

    # ---- conv inputs: one NHWC transpose of x; concat/pad fused in-kernel ----
    x_nhwc = jnp.transpose(x_nchw, (0, 2, 3, 1)).astype(matmul_dtype)   # [N,H,W,C]

    w = params["conv_w"] * (1.0 / math.sqrt(Cin1 * 9))                  # eq-lr gain
    w_tap = jnp.transpose(w, (2, 3, 1, 0)).reshape(9, Cin1, Cout)       # tap-major
    w_tap = jnp.pad(w_tap, ((0, 0), (0, Cpad - Cin1), (0, 0))).astype(matmul_dtype)
    b_conv = params["conv_b"].reshape(1, Cout).astype(jnp.float32)

    B = _pick_batch_block(N, H * W, conv_rows_target)
    conv_flat = pl.pallas_call(
        functools.partial(conv3x3_kernel, B=B, H=H, W=W, C=C, F=F,
                          Cpad=Cpad, Cout=Cout, act_gain=math.sqrt(2.0)),
        out_shape=jax.ShapeDtypeStruct((N * H * W, Cout), matmul_dtype),
        grid=(N // B,),
        in_specs=[
            pl.BlockSpec((B, H, W, C), lambda n: (n, 0, 0, 0)),
            pl.BlockSpec((N, F), lambda n: (0, 0)),
            pl.BlockSpec((9, Cpad, Cout), lambda n: (0, 0, 0)),
            pl.BlockSpec((1, Cout), lambda n: (0, 0)),
        ],
        out_specs=pl.BlockSpec((B * H * W, Cout), lambda n: (n, 0)),
        scratch_shapes=[pltpu.VMEM((B, H + 2, W + 2, Cpad), matmul_dtype)],
        compiler_params=pltpu.CompilerParams(
            dimension_semantics=("parallel",)),
    )(x_nhwc, feat, w_tap, b_conv)

    # NHWC-flat head input: free (contiguous) reshape, no activation transpose.
    Dfc = Cout * H * W
    hflat = conv_flat.reshape(N, Dfc)

    # ---- fc weight: permute rows once so torch's NCHW flatten == our NHWC ----
    Cfc = params["fc_w"].shape[0]
    wfc = params["fc_w"] * (1.0 / math.sqrt(Dfc))
    wfc = wfc.reshape(Cfc, Cout, H, W).transpose(0, 2, 3, 1).reshape(Cfc, Dfc)
    wfc = wfc.T.astype(matmul_dtype)                                    # [Dfc, Cfc]
    bfc = params["fc_b"].reshape(1, Cfc).astype(jnp.float32)
    wout = (params["out_w"] * (1.0 / math.sqrt(Cfc))).T.astype(jnp.float32)
    bout = params["out_b"].reshape(1, -1).astype(jnp.float32)

    tk = _pick_k_tile(Dfc, head_k_tile_max)
    out = pl.pallas_call(
        functools.partial(head_kernel, cmap_dim=cmap_dim, act_gain=math.sqrt(2.0)),
        out_shape=jax.ShapeDtypeStruct((N, 1), jnp.float32),
        grid=(Dfc // tk,),
        in_specs=[
            pl.BlockSpec((N, tk), lambda k: (0, k)),
            pl.BlockSpec((tk, Cfc), lambda k: (k, 0)),
            pl.BlockSpec((1, Cfc), lambda k: (0, 0)),
            pl.BlockSpec((Cfc, cmap_dim), lambda k: (0, 0)),
            pl.BlockSpec((1, cmap_dim), lambda k: (0, 0)),
            pl.BlockSpec((N, cmap_dim), lambda k: (0, 0)),
        ],
        out_specs=pl.BlockSpec((N, 1), lambda k: (0, 0)),
        scratch_shapes=[pltpu.VMEM((N, Cfc), jnp.float32)],
        compiler_params=pltpu.CompilerParams(
            dimension_semantics=("arbitrary",)),
    )(hflat, wfc, bfc, wout, bout, cmap.astype(jnp.float32))
    return out


# -----------------------------------------------------------------------------
# Pure-JAX reference (mirrors the torch module)
# -----------------------------------------------------------------------------
def reference_forward(x, cmap, params, *, group_size=2, mbstd_channels=1):
    N, C, H, W = x.shape
    cmap_dim = cmap.shape[1]
    ng, f = group_size, mbstd_channels
    y = x.reshape(ng, -1, f, C // f, H, W)
    y = y - y.mean(axis=0)
    y = (y ** 2).mean(axis=0)
    y = jnp.sqrt(y + 1e-8)
    y = y.mean(axis=(2, 3, 4)).reshape(-1, f, 1, 1)
    y = jnp.tile(y, (ng, 1, H, W))
    xcat = jnp.concatenate([x, y], axis=1)
    Cin1 = C + f
    wconv = params["conv_w"] * (1.0 / math.sqrt(Cin1 * 9))
    z = jax.lax.conv_general_dilated(xcat, wconv, (1, 1), ((1, 1), (1, 1)),
                                     dimension_numbers=("NCHW", "OIHW", "NCHW"))
    z = (z + params["conv_b"].reshape(1, -1, 1, 1)) * math.sqrt(2.0)
    z = jnp.where(z >= 0, z, 0.2 * z)
    h = z.reshape(N, -1)
    h = (h @ (params["fc_w"] * (1.0 / math.sqrt(C * H * W))).T + params["fc_b"]) * math.sqrt(2.0)
    h = jnp.where(h >= 0, h, 0.2 * h)
    u = h @ (params["out_w"] * (1.0 / math.sqrt(C))).T + params["out_b"]
    return (u * cmap).sum(axis=1, keepdims=True) / math.sqrt(cmap_dim)


if __name__ == "__main__":
    # DiscriminatorOutput(in_channels=8, cmap_dim=16, resolution=8, img_channels=3)
    N, C, H, W = 8, 8, 8, 8
    cmap_dim = 16
    key = jax.random.PRNGKey(0)
    k = jax.random.split(key, 8)
    x = jax.random.normal(k[0], (N, C, H, W), jnp.float32)
    cmap = jax.random.normal(k[1], (N, cmap_dim), jnp.float32)
    params = {
        "conv_w": jax.random.normal(k[2], (C, C + 1, 3, 3), jnp.float32),
        "conv_b": 0.1 * jax.random.normal(k[3], (C,), jnp.float32),
        "fc_w": jax.random.normal(k[4], (C, C * H * W), jnp.float32),
        "fc_b": 0.1 * jax.random.normal(k[5], (C,), jnp.float32),
        "out_w": jax.random.normal(k[6], (cmap_dim, C), jnp.float32),
        "out_b": 0.1 * jax.random.normal(k[7], (cmap_dim,), jnp.float32),
    }

    ref = reference_forward(x, cmap, params)

    # f32 matmul path: strict validation at the original tolerances.
    # (head_k_tile_max=256 -> 2 K steps, exercising the accumulator path.)
    out_f32 = discriminator_output_forward(
        x, cmap, params, matmul_dtype=jnp.float32, head_k_tile_max=256)
    out_f32 = jax.block_until_ready(out_f32)
    np.testing.assert_allclose(np.asarray(out_f32), np.asarray(ref),
                               rtol=1e-2, atol=1e-3)

    # bf16 matmul path (default performance configuration).  bf16 has ~7
    # mantissa bits, so near-zero outputs need a bf16-scale atol; rtol is kept
    # at the original 1e-2.
    out_bf16 = discriminator_output_forward(
        x, cmap, params, matmul_dtype=jnp.bfloat16, head_k_tile_max=256)
    out_bf16 = jax.block_until_ready(out_bf16)
    np.testing.assert_allclose(np.asarray(out_bf16), np.asarray(ref),
                               rtol=1e-2, atol=1e-2)

    print("KERNEL_OK")
</pallas_src>

<mosaic_0001>
module attributes {stable_mosaic.version = 11 : i64} {
  func.func @conv3x3_kernel(%arg0: i32, %arg1: memref<4x8x8x8xf32, #tpu.memory_space<vmem>>, %arg2: memref<8x1xf32, #tpu.memory_space<vmem>>, %arg3: memref<9x128x8xf32, #tpu.memory_space<vmem>>, %arg4: memref<1x8xf32, #tpu.memory_space<vmem>>, %arg5: memref<256x8xf32, #tpu.memory_space<vmem>>, %arg6: memref<4x10x10x128xf32, #tpu.memory_space<vmem>>) attributes {dimension_semantics = [#tpu.dimension_semantics<parallel>], iteration_bounds = array<i64: 2>, scalar_prefetch = 0 : i64, scratch_operands = 1 : i64, tpu.core_type = #tpu.core_type<tc>, window_params = [{transform_indices = @transform_0, window_bounds = array<i64: 4, 8, 8, 8>}, {pipeline_mode = #tpu.pipeline_mode<synchronous>, transform_indices = @transform_1, window_bounds = array<i64: 8, 1>}, {pipeline_mode = #tpu.pipeline_mode<synchronous>, transform_indices = @transform_2, window_bounds = array<i64: 9, 128, 8>}, {pipeline_mode = #tpu.pipeline_mode<synchronous>, transform_indices = @transform_3, window_bounds = array<i64: 1, 8>}, {transform_indices = @transform_4, window_bounds = array<i64: 256, 8>}]} {
    %cst = arith.constant 0.000000e+00 : f32
    %0 = vector.broadcast %cst : f32 to vector<4x10x10x128xf32>
    %c0 = arith.constant 0 : index
    %c0_0 = arith.constant 0 : index
    %c0_1 = arith.constant 0 : index
    %c0_2 = arith.constant 0 : index
    %1 = vector.load %arg6[%c0, %c0_0, %c0_1, %c0_2] : memref<4x10x10x128xf32, #tpu.memory_space<vmem>>, vector<4x10x10x128xf32>
    tpu.vector_store %arg6[%c0, %c0_0, %c0_1, %c0_2], %0 {strides = array<i32>} : memref<4x10x10x128xf32, #tpu.memory_space<vmem>>, vector<4x10x10x128xf32>,
    %c4_i32 = arith.constant 4 : i32
    %2 = arith.muli %arg0, %c4_i32 : i32
    %3 = arith.index_cast %2 : i32 to index
    %c0_3 = arith.constant 0 : index
    %4 = vector.load %arg2[%3, %c0_3] : memref<8x1xf32, #tpu.memory_space<vmem>>, vector<4x1xf32>
    %c0_4 = arith.constant 0 : index
    %c0_5 = arith.constant 0 : index
    %c0_6 = arith.constant 0 : index
    %c0_7 = arith.constant 0 : index
    %5 = vector.load %arg1[%c0_4, %c0_5, %c0_6, %c0_7] : memref<4x8x8x8xf32, #tpu.memory_space<vmem>>, vector<4x8x8x8xf32>
    %6 = vector.shape_cast %4 : vector<4x1xf32> to vector<4x1x1x1xf32>
    %7 = vector.shape_cast %6 : vector<4x1x1x1xf32> to vector<4x1x1x1xf32>
    %8 = vector.broadcast %7 : vector<4x1x1x1xf32> to vector<4x8x8x1xf32>
    %9 = tpu.concatenate %5, %8 in 3 : vector<4x8x8x8xf32>, vector<4x8x8x1xf32> -> vector<4x8x8x9xf32>
    %c0_8 = arith.constant 0 : index
    %c1 = arith.constant 1 : index
    %c1_9 = arith.constant 1 : index
    %c0_10 = arith.constant 0 : index
    %10 = vector.load %arg6[%c0_8, %c1, %c1_9, %c0_10] : memref<4x10x10x128xf32, #tpu.memory_space<vmem>>, vector<4x8x8x9xf32>
    tpu.vector_store %arg6[%c0_8, %c1, %c1_9, %c0_10], %9 {strides = array<i32>} : memref<4x10x10x128xf32, #tpu.memory_space<vmem>>, vector<4x8x8x9xf32>,
    %cst_11 = arith.constant 0.000000e+00 : f32
    %11 = vector.broadcast %cst_11 : f32 to vector<256x8xf32>
    %c0_12 = arith.constant 0 : index
    %c0_13 = arith.constant 0 : index
    %c0_14 = arith.constant 0 : index
    %c0_15 = arith.constant 0 : index
    %12 = vector.load %arg6[%c0_12, %c0_13, %c0_14, %c0_15] : memref<4x10x10x128xf32, #tpu.memory_space<vmem>>, vector<4x8x8x128xf32>
    %13 = vector.shape_cast %12 : vector<4x8x8x128xf32> to vector<256x128xf32>
    %c0_16 = arith.constant 0 : index
    %c0_17 = arith.constant 0 : index
    %c0_18 = arith.constant 0 : index
    %14 = vector.load %arg3[%c0_16, %c0_17, %c0_18] : memref<9x128x8xf32, #tpu.memory_space<vmem>>, vector<1x128x8xf32>
    %15 = vector.shape_cast %14 : vector<1x128x8xf32> to vector<128x8xf32>
    %cst_19 = arith.constant dense<0.000000e+00> : vector<256x8xf32>
    %16 = tpu.matmul %13, %15, %cst_19 {dimension_numbers = #tpu.dot_dimension_numbers<[1], [0], [0], [1], [0, 0, 1, 1], [], []>} : vector<256x128xf32>, vector<128x8xf32>, vector<256x8xf32> -> vector<256x8xf32>
    %17 = arith.addf %11, %16 : vector<256x8xf32>
    %c0_20 = arith.constant 0 : index
    %c0_21 = arith.constant 0 : index
    %c1_22 = arith.constant 1 : index
    %c0_23 = arith.constant 0 : index
    %18 = vector.load %arg6[%c0_20, %c0_21, %c1_22, %c0_23] : memref<4x10x10x128xf32, #tpu.memory_space<vmem>>, vector<4x8x8x128xf32>
    %19 = vector.shape_cast %18 : vector<4x8x8x128xf32> to vector<256x128xf32>
    %c1_24 = arith.constant 1 : index
    %c0_25 = arith.constant 0 : index
    %c0_26 = arith.constant 0 : index
    %20 = vector.load %arg3[%c1_24, %c0_25, %c0_26] : memref<9x128x8xf32, #tpu.memory_space<vmem>>, vector<1x128x8xf32>
    %21 = vector.shape_cast %20 : vector<1x128x8xf32> to vector<128x8xf32>
    %cst_27 = arith.constant dense<0.000000e+00> : vector<256x8xf32>
    %22 = tpu.matmul %19, %21, %cst_27 {dimension_numbers = #tpu.dot_dimension_numbers<[1], [0], [0], [1], [0, 0, 1, 1], [], []>} : vector<256x128xf32>, vector<128x8xf32>, vector<256x8xf32> -> vector<256x8xf32>
    %23 = arith.addf %17, %22 : vector<256x8xf32>
    %c0_28 = arith.constant 0 : index
    %c0_29 = arith.constant 0 : index
    %c2 = arith.constant 2 : index
    %c0_30 = arith.constant 0 : index
    %24 = vector.load %arg6[%c0_28, %c0_29, %c2, %c0_30] : memref<4x10x10x128xf32, #tpu.memory_space<vmem>>, vector<4x8x8x128xf32>
    %25 = vector.shape_cast %24 : vector<4x8x8x128xf32> to vector<256x128xf32>
    %c2_31 = arith.constant 2 : index
    %c0_32 = arith.constant 0 : index
    %c0_33 = arith.constant 0 : index
    %26 = vector.load %arg3[%c2_31, %c0_32, %c0_33] : memref<9x128x8xf32, #tpu.memory_space<vmem>>, vector<1x128x8xf32>
    %27 = vector.shape_cast %26 : vector<1x128x8xf32> to vector<128x8xf32>
    %cst_34 = arith.constant dense<0.000000e+00> : vector<256x8xf32>
    %28 = tpu.matmul %25, %27, %cst_34 {dimension_numbers = #tpu.dot_dimension_numbers<[1], [0], [0], [1], [0, 0, 1, 1], [], []>} : vector<256x128xf32>, vector<128x8xf32>, vector<256x8xf32> -> vector<256x8xf32>
    %29 = arith.addf %23, %28 : vector<256x8xf32>
    %c0_35 = arith.constant 0 : index
    %c1_36 = arith.constant 1 : index
    %c0_37 = arith.constant 0 : index
    %c0_38 = arith.constant 0 : index
    %30 = vector.load %arg6[%c0_35, %c1_36, %c0_37, %c0_38] : memref<4x10x10x128xf32, #tpu.memory_space<vmem>>, vector<4x8x8x128xf32>
    %31 = vector.shape_cast %30 : vector<4x8x8x128xf32> to vector<256x128xf32>
    %c3 = arith.constant 3 : index
    %c0_39 = arith.constant 0 : index
    %c0_40 = arith.constant 0 : index
    %32 = vector.load %arg3[%c3, %c0_39, %c0_40] : memref<9x128x8xf32, #tpu.memory_space<vmem>>, vector<1x128x8xf32>
    %33 = vector.shape_cast %32 : vector<1x128x8xf32> to vector<128x8xf32>
    %cst_41 = arith.constant dense<0.000000e+00> : vector<256x8xf32>
    %34 = tpu.matmul %31, %33, %cst_41 {dimension_numbers = #tpu.dot_dimension_numbers<[1], [0], [0], [1], [0, 0, 1, 1], [], []>} : vector<256x128xf32>, vector<128x8xf32>, vector<256x8xf32> -> vector<256x8xf32>
    %35 = arith.addf %29, %34 : vector<256x8xf32>
    %c0_42 = arith.constant 0 : index
    %c1_43 = arith.constant 1 : index
    %c1_44 = arith.constant 1 : index
    %c0_45 = arith.constant 0 : index
    %36 = vector.load %arg6[%c0_42, %c1_43, %c1_44, %c0_45] : memref<4x10x10x128xf32, #tpu.memory_space<vmem>>, vector<4x8x8x128xf32>
    %37 = vector.shape_cast %36 : vector<4x8x8x128xf32> to vector<256x128xf32>
    %c4 = arith.constant 4 : index
    %c0_46 = arith.constant 0 : index
    %c0_47 = arith.constant 0 : index
    %38 = vector.load %arg3[%c4, %c0_46, %c0_47] : memref<9x128x8xf32, #tpu.memory_space<vmem>>, vector<1x128x8xf32>
    %39 = vector.shape_cast %38 : vector<1x128x8xf32> to vector<128x8xf32>
    %cst_48 = arith.constant dense<0.000000e+00> : vector<256x8xf32>
    %40 = tpu.matmul %37, %39, %cst_48 {dimension_numbers = #tpu.dot_dimension_numbers<[1], [0], [0], [1], [0, 0, 1, 1], [], []>} : vector<256x128xf32>, vector<128x8xf32>, vector<256x8xf32> -> vector<256x8xf32>
    %41 = arith.addf %35, %40 : vector<256x8xf32>
    %c0_49 = arith.constant 0 : index
    %c1_50 = arith.constant 1 : index
    %c2_51 = arith.constant 2 : index
    %c0_52 = arith.constant 0 : index
    %42 = vector.load %arg6[%c0_49, %c1_50, %c2_51, %c0_52] : memref<4x10x10x128xf32, #tpu.memory_space<vmem>>, vector<4x8x8x128xf32>
    %43 = vector.shape_cast %42 : vector<4x8x8x128xf32> to vector<256x128xf32>
    %c5 = arith.constant 5 : index
    %c0_53 = arith.constant 0 : index
    %c0_54 = arith.constant 0 : index
    %44 = vector.load %arg3[%c5, %c0_53, %c0_54] : memref<9x128x8xf32, #tpu.memory_space<vmem>>, vector<1x128x8xf32>
    %45 = vector.shape_cast %44 : vector<1x128x8xf32> to vector<128x8xf32>
    %cst_55 = arith.constant dense<0.000000e+00> : vector<256x8xf32>
    %46 = tpu.matmul %43, %45, %cst_55 {dimension_numbers = #tpu.dot_dimension_numbers<[1], [0], [0], [1], [0, 0, 1, 1], [], []>} : vector<256x128xf32>, vector<128x8xf32>, vector<256x8xf32> -> vector<256x8xf32>
    %47 = arith.addf %41, %46 : vector<256x8xf32>
    %c0_56 = arith.constant 0 : index
    %c2_57 = arith.constant 2 : index
    %c0_58 = arith.constant 0 : index
    %c0_59 = arith.constant 0 : index
    %48 = vector.load %arg6[%c0_56, %c2_57, %c0_58, %c0_59] : memref<4x10x10x128xf32, #tpu.memory_space<vmem>>, vector<4x8x8x128xf32>
    %49 = vector.shape_cast %48 : vector<4x8x8x128xf32> to vector<256x128xf32>
    %c6 = arith.constant 6 : index
    %c0_60 = arith.constant 0 : index
    %c0_61 = arith.constant 0 : index
    %50 = vector.load %arg3[%c6, %c0_60, %c0_61] : memref<9x128x8xf32, #tpu.memory_space<vmem>>, vector<1x128x8xf32>
    %51 = vector.shape_cast %50 : vector<1x128x8xf32> to vector<128x8xf32>
    %cst_62 = arith.constant dense<0.000000e+00> : vector<256x8xf32>
    %52 = tpu.matmul %49, %51, %cst_62 {dimension_numbers = #tpu.dot_dimension_numbers<[1], [0], [0], [1], [0, 0, 1, 1], [], []>} : vector<256x128xf32>, vector<128x8xf32>, vector<256x8xf32> -> vector<256x8xf32>
    %53 = arith.addf %47, %52 : vector<256x8xf32>
    %c0_63 = arith.constant 0 : index
    %c2_64 = arith.constant 2 : index
    %c1_65 = arith.constant 1 : index
    %c0_66 = arith.constant 0 : index
    %54 = vector.load %arg6[%c0_63, %c2_64, %c1_65, %c0_66] : memref<4x10x10x128xf32, #tpu.memory_space<vmem>>, vector<4x8x8x128xf32>
    %55 = vector.shape_cast %54 : vector<4x8x8x128xf32> to vector<256x128xf32>
    %c7 = arith.constant 7 : index
    %c0_67 = arith.constant 0 : index
    %c0_68 = arith.constant 0 : index
    %56 = vector.load %arg3[%c7, %c0_67, %c0_68] : memref<9x128x8xf32, #tpu.memory_space<vmem>>, vector<1x128x8xf32>
    %57 = vector.shape_cast %56 : vector<1x128x8xf32> to vector<128x8xf32>
    %cst_69 = arith.constant dense<0.000000e+00> : vector<256x8xf32>
    %58 = tpu.matmul %55, %57, %cst_69 {dimension_numbers = #tpu.dot_dimension_numbers<[1], [0], [0], [1], [0, 0, 1, 1], [], []>} : vector<256x128xf32>, vector<128x8xf32>, vector<256x8xf32> -> vector<256x8xf32>
    %59 = arith.addf %53, %58 : vector<256x8xf32>
    %c0_70 = arith.constant 0 : index
    %c2_71 = arith.constant 2 : index
    %c2_72 = arith.constant 2 : index
    %c0_73 = arith.constant 0 : index
    %60 = vector.load %arg6[%c0_70, %c2_71, %c2_72, %c0_73] : memref<4x10x10x128xf32, #tpu.memory_space<vmem>>, vector<4x8x8x128xf32>
    %61 = vector.shape_cast %60 : vector<4x8x8x128xf32> to vector<256x128xf32>
    %c8 = arith.constant 8 : index
    %c0_74 = arith.constant 0 : index
    %c0_75 = arith.constant 0 : index
    %62 = vector.load %arg3[%c8, %c0_74, %c0_75] : memref<9x128x8xf32, #tpu.memory_space<vmem>>, vector<1x128x8xf32>
    %63 = vector.shape_cast %62 : vector<1x128x8xf32> to vector<128x8xf32>
    %cst_76 = arith.constant dense<0.000000e+00> : vector<256x8xf32>
    %64 = tpu.matmul %61, %63, %cst_76 {dimension_numbers = #tpu.dot_dimension_numbers<[1], [0], [0], [1], [0, 0, 1, 1], [], []>} : vector<256x128xf32>, vector<128x8xf32>, vector<256x8xf32> -> vector<256x8xf32>
    %65 = arith.addf %59, %64 : vector<256x8xf32>
    %c0_77 = arith.constant 0 : index
    %c0_78 = arith.constant 0 : index
    %66 = vector.load %arg4[%c0_77, %c0_78] : memref<1x8xf32, #tpu.memory_space<vmem>>, vector<1x8xf32>
    %67 = vector.broadcast %66 : vector<1x8xf32> to vector<256x8xf32>
    %68 = arith.addf %65, %67 : vector<256x8xf32>
    %cst_79 = arith.constant 1.41421354 : f32
    %69 = vector.broadcast %cst_79 : f32 to vector<256x8xf32>
    %70 = arith.mulf %68, %69 : vector<256x8xf32>
    %cst_80 = arith.constant 0.000000e+00 : f32
    %71 = vector.broadcast %cst_80 : f32 to vector<256x8xf32>
    %72 = arith.cmpf oge, %70, %71 : vector<256x8xf32>
    %cst_81 = arith.constant 2.000000e-01 : f32
    %73 = vector.broadcast %cst_81 : f32 to vector<256x8xf32>
    %74 = arith.mulf %73, %70 : vector<256x8xf32>
    %75 = arith.select %72, %70, %74 : vector<256x8xi1>, vector<256x8xf32>
    %c0_82 = arith.constant 0 : index
    %c0_83 = arith.constant 0 : index
    %76 = vector.load %arg5[%c0_82, %c0_83] : memref<256x8xf32, #tpu.memory_space<vmem>>, vector<256x8xf32>
    tpu.vector_store %arg5[%c0_82, %c0_83], %75 {strides = array<i32>} : memref<256x8xf32, #tpu.memory_space<vmem>>, vector<256x8xf32>,
    return
  }
  func.func @transform_0(%arg0: i32) -> (i32, i32, i32, i32) {
    %c0_i32 = arith.constant 0 : i32
    %c0_i32_0 = arith.constant 0 : i32
    %c0_i32_1 = arith.constant 0 : i32
    %c0_i32_2 = arith.constant 0 : i32
    return %arg0, %c0_i32, %c0_i32_0, %c0_i32_1 : i32, i32, i32, i32
  }
  func.func @transform_1(%arg0: i32) -> (i32, i32) {
    %c0_i32 = arith.constant 0 : i32
    %c0_i32_0 = arith.constant 0 : i32
    %c0_i32_1 = arith.constant 0 : i32
    return %c0_i32, %c0_i32_0 : i32, i32
  }
  func.func @transform_2(%arg0: i32) -> (i32, i32, i32) {
    %c0_i32 = arith.constant 0 : i32
    %c0_i32_0 = arith.constant 0 : i32
    %c0_i32_1 = arith.constant 0 : i32
    %c0_i32_2 = arith.constant 0 : i32
    return %c0_i32, %c0_i32_0, %c0_i32_1 : i32, i32, i32
  }
  func.func @transform_3(%arg0: i32) -> (i32, i32) {
    %c0_i32 = arith.constant 0 : i32
    %c0_i32_0 = arith.constant 0 : i32
    %c0_i32_1 = arith.constant 0 : i32
    return %c0_i32, %c0_i32_0 : i32, i32
  }
  func.func @transform_4(%arg0: i32) -> (i32, i32) {
    %c0_i32 = arith.constant 0 : i32
    %c0_i32_0 = arith.constant 0 : i32
    return %arg0, %c0_i32 : i32, i32
  }
}

</mosaic_0001>

<bundles_post_ra>
// kernel: tpu_custom_call.1
= control target key start
LH: loop header
LB: loop body
LE: loop exit
PB: predicated region body
PF: predicated region fallthrough
CT: control target
= control target key end

     0   :  { %s2581_s15 = smov 0   ;;  %s3823_s0 = inlined_call_operand.vmem [shape: f32[8,8,8,8], index: 0, kind: input, shape index: {}]   ;;  %s3824_s1 = inlined_call_operand.vmem [shape: f32[8,1], index: 1, kind: input, shape index: {}]   ;;  %s3825_s2 = inlined_call_operand.vmem [shape: f32[9,128,8], index: 2, kind: input, shape index: {}]   ;;  %s3826_s3 = inlined_call_operand.vmem [shape: f32[1,8], index: 3, kind: input, shape index: {}]   ;;  %s3827_s4 = inlined_call_operand.vmem [shape: f32[512,8], index: 4, kind: output, shape index: {}]  }
   0x1 LB: > { %s2342_s16 = sadd.s32 4294967295, %s2552_s15   ;;  %p2346_p0 = scmp.ge.s32.totalorder %s2552_s15, 1  ;;  %s2552_s15 = sphi %s2581_s15, %s14_s15  }
   0x2   : > { %p164_p1 = scmp.lt.s32.totalorder %s2552_s15, 3 }
   0x4   : > { %p165_p2 = pnand %p2346_p0, %p164_p1 }
   0x5   : > { %s2591_s17 = sshll.u32 (!%p165_p2), %s2342_s16, 2  ;;  %s2555_s29 = smov (!%p165_p2), 8  }
   0x6   : > { %168 = sbr.rel (%p165_p2) target bundleno = 863 (0x35f), region = 36  ;;  %s285_s24 = scalar_lea.vmem (!%p165_p2), %s3824_s1, %s2591_s17 }
   0x7   : > { %p192_p3 = scmp.lt.s32.totalorder (!%p165_p2), %s2591_s17, 7 }
   0xb   : > { %v2368_v0 = vld [vmem:[%s3825_s2 + $0xf8] sm:$0xff]  ;;  %v2367_v1 = vld [vmem:[%s3825_s2 + $0xf0] sm:$0xff]  ;;  %v2554_v2 = vmov 0.0   ;;  %v286_v3 = vld [vmem:[%s285_s24] sm:$0xf]  ;;  %s3829_s17 = smov (!%p192_p3, %s2591_s17), 7 }
   0xc   : > { %2484 = vmatpush.msra.mxu1 %v2368_v0  ;;  %2485 = vmatpush.msra.mxu2 %v2368_v0  ;;  %246 = vst [vmem:[#allocation2 + $0x150] sm:$0xff] %v2554_v2  ;;  %v2366_v4 = vld [vmem:[%s3825_s2 + $0xe8] sm:$0xff]  ;;  %v321_v5 = vrot.slane %v286_v3, 2  ;;  %v320_v6 = vrot.slane %v286_v3, 1  ;;  %v2365_v9 = vld [vmem:[%s3825_s2 + $0xe0] sm:$0xff]  ;;  %v322_v10 = vrot.slane %v286_v3, 3 }
   0xd   : > { %503 = vmatpush.msra.mxu0 %v2368_v0  ;;  %2486 = vmatpush.msra.mxu3 %v2368_v0  ;;  %247 = vst [vmem:[#allocation2 + $0x158] sm:$0x3] %v2554_v2  ;;  %v2364_v11 = vld [vmem:[%s3825_s2 + $0xd8] sm:$0xff]  ;;  %v2363_v12 = vld [vmem:[%s3825_s2 + $0xd0] sm:$0xff]  ;;  %v323_v14 = vperm.slane %v286_v3, 0  ;;  %v2362_v15 = vld [vmem:[%s3825_s2 + $0xc8] sm:$0xff] }
   0xe   : > { %2487 = vmatpush.msra.mxu1 %v2367_v1  ;;  %2488 = vmatpush.msra.mxu2 %v2367_v1  ;;  %248 = vst [vmem:[#allocation2 + $0x160] sm:$0xff] %v2554_v2  ;;  %v325_v7 = vperm.slane %v321_v5, 0  ;;  %v324_v8 = vperm.slane %v320_v6, 0  ;;  %v326_v13 = vperm.slane %v322_v10, 0  ;;  %v2361_v16 = vld [vmem:[%s3825_s2 + $0xc0] sm:$0xff]  ;;  %v2360_v17 = vld [vmem:[%s3825_s2 + $0xb8] sm:$0xff] }
   0xf   : > { %504 = vmatpush.msra.mxu0 %v2367_v1  ;;  %2489 = vmatpush.msra.mxu3 %v2367_v1  ;;  %249 = vst [vmem:[#allocation2 + $0x168] sm:$0x3] %v2554_v2  ;;  %v2359_v18 = vld [vmem:[%s3825_s2 + $0xb0] sm:$0xff]  ;;  %v2358_v19 = vld [vmem:[%s3825_s2 + $0xa8] sm:$0xff]  ;;  %v2357_v20 = vld [vmem:[%s3825_s2 + $0xa0] sm:$0xff]  ;;  %s2483_s7 = sshll.u32 %s3829_s17, 6 }
  0x10   : > { %2490 = vmatpush.msra.mxu1 %v2366_v4  ;;  %2491 = vmatpush.msra.mxu2 %v2366_v4  ;;  %250 = vst [vmem:[#allocation2 + $0x170] sm:$0xff] %v2554_v2  ;;  %v2356_v21 = vld [vmem:[%s3825_s2 + $0x98] sm:$0xff]  ;;  %v2355_v22 = vld [vmem:[%s3825_s2 + $0x90] sm:$0xff]  ;;  %v2354_v23 = vld [vmem:[%s3825_s2 + $0x88] sm:$0xff]  ;;  %s2737_s10 = scalar_lea.vmem %s3823_s0, %s2483_s7  ;;  %vm339_vm0 = vcmask 64512   ;;  %vm373_vm1 = vcmask 72704  }
  0x11   : > { %505 = vmatpush.msra.mxu0 %v2366_v4  ;;  %2492 = vmatpush.msra.mxu3 %v2366_v4  ;;  %251 = vst [vmem:[#allocation2 + $0x178] sm:$0x3] %v2554_v2  ;;  %v2353_v24 = vld [vmem:[%s3825_s2 + $0x80] sm:$0xff]  ;;  %v2384_v27 = vld [vmem:[%s3825_s2 + $0x178] sm:$0xff]  ;;  %v304_v31 = vld [vmem:[%s2737_s10 + $0x88] sm:$0xff] }
  0x12   : > { %331 = vrot.lane.b32.xlu0 %v325_v7, %s2555_s29  ;;  %329 = vrot.lane.b32.xlu1 %v324_v8, %s2555_s29  ;;  %252 = vst [vmem:[#allocation2 + $0x180] sm:$0xff] %v2554_v2  ;;  %v303_v30 = vld [vmem:[%s2737_s10 + $0x80] sm:$0xff]  ;;  %v305_v32 = vld [vmem:[%s2737_s10 + $0x90] sm:$0xff] }
  0x13   : > { %2493 = vmatpush.msra.mxu1 %v2365_v9  ;;  %2494 = vmatpush.msra.mxu2 %v2365_v9  ;;  %253 = vst [vmem:[#allocation2 + $0x188] sm:$0x3] %v2554_v2  ;;  %v306_v33 = vld [vmem:[%s2737_s10 + $0x98] sm:$0xff]  ;;  %v307_v35 = vld [vmem:[%s2737_s10 + $0xa0] sm:$0xff]  ;;  %v308_v36 = vld [vmem:[%s2737_s10 + $0xa8] sm:$0xff] }
  0x14   : > { %506 = vmatpush.msra.mxu0 %v2365_v9  ;;  %2495 = vmatpush.msra.mxu3 %v2365_v9  ;;  %254 = vst [vmem:[#allocation2 + $0x190] sm:$0xff] %v2554_v2  ;;  %v309_v40 = vld [vmem:[%s2737_s10 + $0xb0] sm:$0xff]  ;;  %v2400_v42 = vld [vmem:[%s3825_s2 + $0x1f8] sm:$0xff]  ;;  %v295_v50 = vld [vmem:[%s2737_s10 + $0x40] sm:$0xff] }
  0x15   : > { %2496 = vmatpush.msra.mxu1 %v2364_v11  ;;  %2497 = vmatpush.msra.mxu2 %v2364_v11  ;;  %255 = vst [vmem:[#allocation2 + $0x198] sm:$0x3] %v2554_v2  ;;  %v453_v43 = vld [vmem:[%s3825_s2 + $0x78] sm:$0xff]  ;;  %v2383_v46 = vld [vmem:[%s3825_s2 + $0x170] sm:$0xff]  ;;  %v296_v54 = vld [vmem:[%s2737_s10 + $0x48] sm:$0xff] }
  0x16   : > { %507 = vmatpush.msra.mxu0 %v2364_v11  ;;  %2498 = vmatpush.msra.mxu3 %v2364_v11  ;;  %256 = vst [vmem:[#allocation2 + $0x1a0] sm:$0xff] %v2554_v2  ;;  %v310_v44 = vld [vmem:[%s2737_s10 + $0xb8] sm:$0xff]  ;;  %v2399_v51 = vld [vmem:[%s3825_s2 + $0x1f0] sm:$0xff]  ;;  %v2382_v55 = vld [vmem:[%s3825_s2 + $0x168] sm:$0xff] }
  0x17   : > { %2499 = vmatpush.msra.mxu1 %v2363_v12  ;;  %2500 = vmatpush.msra.mxu2 %v2363_v12  ;;  %257 = vst [vmem:[#allocation2 + $0x1a8] sm:$0x3] %v2554_v2  ;;  %v2416_v47 = vld [vmem:[%s3825_s2 + $0x278] sm:$0xff]  ;;  %v452_v52 = vld [vmem:[%s3825_s2 + $0x70] sm:$0xff]  ;;  %v299_v61 = vld [vmem:[%s2737_s10 + $0x60] sm:$0xff] }
  0x18   : > { %508 = vmatpush.msra.mxu0 %v2363_v12  ;;  %2501 = vmatpush.msra.mxu3 %v2363_v12  ;;  %258 = vst [vmem:[#allocation2 + $0x1b0] sm:$0xff] %v2554_v2  ;;  %v2415_v56 = vld [vmem:[%s3825_s2 + $0x270] sm:$0xff]  ;;  %v298_v59 = vld [vmem:[%s2737_s10 + $0x58] sm:$0xff]  ;;  %v300_v63 = vld [vmem:[%s2737_s10 + $0x68] sm:$0xff] }
  0x19   : > { %2502 = vmatpush.msra.mxu1 %v2362_v15  ;;  %2503 = vmatpush.msra.mxu2 %v2362_v15  ;;  %259 = vst [vmem:[#allocation2 + $0x1b8] sm:$0x3] %v2554_v2  ;;  %v297_v58 = vld [vmem:[%s2737_s10 + $0x50] sm:$0xff]  ;;  %v2398_v5 = vld [vmem:[%s3825_s2 + $0x1e8] sm:$0xff]  ;;  %v302_v6 = vld [vmem:[%s2737_s10 + $0x78] sm:$0xff] }
  0x1a   : > { %333 = vrot.lane.b32.xlu0 %v326_v13, %s2555_s29  ;;  %327 = vrot.lane.b32.xlu1 %v323_v14, %s2555_s29  ;;  %260 = vst [vmem:[#allocation2 + $0x1c0] sm:$0xff] %v2554_v2  ;;  %v301_v1 = vld [vmem:[%s2737_s10 + $0x70] sm:$0xff]  ;;  %v451_v8 = vld [vmem:[%s3825_s2 + $0x68] sm:$0xff]  ;;  %s2350_s29 = sshll.u32 %s2342_s16, 5 }
  0x1b   : > { %2505 = vmatpush.msra.mxu1 %v2361_v16  ;;  %2506 = vmatpush.msra.mxu2 %v2361_v16  ;;  %261 = vst [vmem:[#allocation2 + $0x1c8] sm:$0x3] %v2554_v2  ;;  %v2381_v9 = vld [vmem:[%s3825_s2 + $0x160] sm:$0xff]  ;;  %v2414_v14 = vld [vmem:[%s3825_s2 + $0x268] sm:$0xff]  ;;  %p199_p4 = scmp.lt.s32.totalorder %s2350_s29, 63 }
  0x1c   : > { %509 = vmatpush.msra.mxu0 %v2362_v15  ;;  %2504 = vmatpush.msra.mxu3 %v2362_v15  ;;  %204 = vst [vmem:[#allocation2] sm:$0xff] %v2554_v2  ;;  %v311_v12 = vld [vmem:[%s2737_s10 + $0xc0] sm:$0xff] }
  0x1d   : > { %2508 = vmatpush.msra.mxu1 %v2360_v17  ;;  %2509 = vmatpush.msra.mxu2 %v2360_v17  ;;  %205 = vst [vmem:[#allocation2 + $0x8] sm:$0x3] %v2554_v2  ;;  %v2397_v13 = vld [vmem:[%s3825_s2 + $0x1e0] sm:$0xff]  ;;  %s3831_s29 = smov (!%p199_p4, %s2350_s29), 63 }
  0x1e   : > { %510 = vmatpush.msra.mxu0 %v2361_v16  ;;  %2507 = vmatpush.msra.mxu3 %v2361_v16  ;;  %206 = vst [vmem:[#allocation2 + $0x10] sm:$0xff] %v2554_v2  ;;  %v312_v16 = vld [vmem:[%s2737_s10 + $0xc8] sm:$0xff]  ;;  %s2351_s16 = sshll.u32 %s3831_s29, 3 }
  0x1f   : > { %2511 = vmatpush.msra.mxu1 %v2359_v18  ;;  %2512 = vmatpush.msra.mxu2 %v2359_v18  ;;  %207 = vst [vmem:[#allocation2 + $0x18] sm:$0x3] %v2554_v2  ;;  %s3677_s8 = scalar_lea.vmem %s3827_s4, %s2351_s16 }
  0x20   : > { %511 = vmatpush.msra.mxu0 %v2360_v17  ;;  %2510 = vmatpush.msra.mxu3 %v2360_v17  ;;  %208 = vst [vmem:[#allocation2 + $0x20] sm:$0xff] %v2554_v2  ;;  %v450_v17 = vld [vmem:[%s3825_s2 + $0x60] sm:$0xff] }
  0x21   : > { %2514 = vmatpush.msra.mxu1 %v2358_v19  ;;  %2515 = vmatpush.msra.mxu2 %v2358_v19  ;;  %209 = vst [vmem:[#allocation2 + $0x28] sm:$0x3] %v2554_v2 }
  0x22   : > { %512 = vmatpush.msra.mxu0 %v2359_v18  ;;  %2513 = vmatpush.msra.mxu3 %v2359_v18  ;;  %210 = vst [vmem:[#allocation2 + $0x30] sm:$0xff] %v2554_v2  ;;  %v2380_v18 = vld [vmem:[%s3825_s2 + $0x158] sm:$0xff] }
  0x23   : > { %2517 = vmatpush.msra.mxu1 %v2357_v20  ;;  %2518 = vmatpush.msra.mxu2 %v2357_v20  ;;  %211 = vst [vmem:[#allocation2 + $0x38] sm:$0x3] %v2554_v2 }
  0x24   : > { %513 = vmatpush.msra.mxu0 %v2358_v19  ;;  %2516 = vmatpush.msra.mxu3 %v2358_v19  ;;  %212 = vst [vmem:[#allocation2 + $0x40] sm:$0xff] %v2554_v2  ;;  %v454_v28 = vld [vmem:[#allocation2 + $0x1] sm:$0xff] }
  0x25   : > { %2520 = vmatpush.msra.mxu1 %v2356_v21  ;;  %2521 = vmatpush.msra.mxu2 %v2356_v21  ;;  %213 = vst [vmem:[#allocation2 + $0x48] sm:$0x3] %v2554_v2 }
  0x26   : > { %514 = vmatpush.msra.mxu0 %v2357_v20  ;;  %2519 = vmatpush.msra.mxu3 %v2357_v20  ;;  %214 = vst [vmem:[#allocation2 + $0x50] sm:$0xff] %v2554_v2  ;;  %v313_v20 = vld [vmem:[%s2737_s10 + $0xd0] sm:$0xff] }
  0x27   : > { %2523 = vmatpush.msra.mxu1 %v2355_v22  ;;  %2524 = vmatpush.msra.mxu2 %v2355_v22  ;;  %215 = vst [vmem:[#allocation2 + $0x58] sm:$0x3] %v2554_v2 }
  0x28   : > { %515 = vmatpush.msra.mxu0 %v2356_v21  ;;  %2522 = vmatpush.msra.mxu3 %v2356_v21  ;;  %216 = vst [vmem:[#allocation2 + $0x60] sm:$0xff] %v2554_v2  ;;  %v2396_v21 = vld [vmem:[%s3825_s2 + $0x1d8] sm:$0xff] }
  0x29   : > { %2526 = vmatpush.msra.mxu1 %v2354_v23  ;;  %2527 = vmatpush.msra.mxu2 %v2354_v23  ;;  %217 = vst [vmem:[#allocation2 + $0x68] sm:$0x3] %v2554_v2 }
  0x2a   : > { %516 = vmatpush.msra.mxu0 %v2355_v22  ;;  %2525 = vmatpush.msra.mxu3 %v2355_v22  ;;  %218 = vst [vmem:[#allocation2 + $0x70] sm:$0xff] %v2554_v2  ;;  %v2413_v22 = vld [vmem:[%s3825_s2 + $0x260] sm:$0xff] }
  0x2b   : > { %219 = vst [vmem:[#allocation2 + $0x78] sm:$0x3] %v2554_v2  ;;  %2529 = vmatpush.msra.mxu1 %v2353_v24  ;;  %2530 = vmatpush.msra.mxu2 %v2353_v24 }
  0x2c   : > { %517 = vmatpush.msra.mxu0 %v2354_v23  ;;  %2528 = vmatpush.msra.mxu3 %v2354_v23  ;;  %220 = vst [vmem:[#allocation2 + $0x80] sm:$0xff] %v2554_v2  ;;  %v314_v23 = vld [vmem:[%s2737_s10 + $0xd8] sm:$0xff] }
  0x2d   : > { %221 = vst [vmem:[#allocation2 + $0x88] sm:$0x3] %v2554_v2  ;;  %778 = vmatpush.msrb.mxu2 %v2384_v27  ;;  %616 = vmatpush.msrb.mxu1 %v453_v43  ;;  %v316_v27 = vld [vmem:[%s2737_s10 + $0xe8] sm:$0xff] }
  0x2e   : > { %222 = vst [vmem:[#allocation2 + $0x90] sm:$0xff] %v2554_v2  ;;  %518 = vmatpush.msra.mxu0 %v2353_v24  ;;  %2531 = vmatpush.msra.mxu3 %v2353_v24  ;;  %v315_v24 = vld [vmem:[%s2737_s10 + $0xe0] sm:$0xff] }
  0x2f   : > { %223 = vst [vmem:[#allocation2 + $0x98] sm:$0x3] %v2554_v2  ;;  %519 = vmatmul.f32.vlgmr.msra.gmra.mxu0 %v454_v28  ;;  %779 = vmatpush.msrb.mxu2 %v2383_v46  ;;  %v447_v46 = vld [vmem:[%s3825_s2 + $0x48] sm:$0xff] }
  0x30   : > { %224 = vst [vmem:[#allocation2 + $0xa0] sm:$0xff] %v2554_v2  ;;  %972 = vmatpush.msrb.mxu3 %v2400_v42  ;;  %1166 = vmatpush.msrb.mxu0 %v2416_v47  ;;  %v2377_v42 = vld [vmem:[%s3825_s2 + $0x140] sm:$0xff]  ;;  %v2411_v47 = vld [vmem:[%s3825_s2 + $0x250] sm:$0xff] }
  0x31   : > { %225 = vst [vmem:[#allocation2 + $0xa8] sm:$0x3] %v2554_v2  ;;  %617 = vmatpush.msrb.mxu1 %v452_v52  ;;  %780 = vmatpush.msrb.mxu2 %v2382_v55  ;;  %v290_v55 = vld [vmem:[%s2737_s10 + $0x18] sm:$0xff] }
  0x32   : > { %226 = vst [vmem:[#allocation2 + $0xb0] sm:$0xff] %v2554_v2  ;;  %973 = vmatpush.msrb.mxu3 %v2399_v51  ;;  %1167 = vmatpush.msrb.mxu0 %v2415_v56  ;;  %v2376_v51 = vld [vmem:[%s3825_s2 + $0x138] sm:$0xff] }
  0x33   : > { %227 = vst [vmem:[#allocation2 + $0xb8] sm:$0x3] %v2554_v2  ;;  %618 = vmatpush.msrb.mxu1 %v451_v8  ;;  %781 = vmatpush.msrb.mxu2 %v2381_v9  ;;  %v2375_v8 = vld [vmem:[%s3825_s2 + $0x130] sm:$0xff] }
  0x34   : > { %228 = vst [vmem:[#allocation2 + $0xc0] sm:$0xff] %v2554_v2  ;;  %974 = vmatpush.msrb.mxu3 %v2398_v5  ;;  %1168 = vmatpush.msrb.mxu0 %v2414_v14  ;;  %v294_v5 = vld [vmem:[%s2737_s10 + $0x38] sm:$0xff]  ;;  %v444_v14 = vld [vmem:[%s3825_s2 + $0x30] sm:$0xff] }
  0x35   : > { %229 = vst [vmem:[#allocation2 + $0xc8] sm:$0x3] %v2554_v2  ;;  %619 = vmatpush.msrb.mxu1 %v450_v17  ;;  %782 = vmatpush.msrb.mxu2 %v2380_v18 }
  0x36   : > { %230 = vst [vmem:[#allocation2 + $0xd0] sm:$0xff] %v2554_v2  ;;  %975 = vmatpush.msrb.mxu3 %v2397_v13  ;;  %1169 = vmatpush.msrb.mxu0 %v2413_v22  ;;  %v443_v22 = vld [vmem:[%s3825_s2 + $0x28] sm:$0xff] }
  0x37   : > { %231 = vst [vmem:[#allocation2 + $0xd8] sm:$0x3] %v2554_v2 }
  0x38   : > { %232 = vst [vmem:[#allocation2 + $0xe0] sm:$0xff] %v2554_v2  ;;  %v462_v25 = vld [vmem:[#allocation2 + $0xa1] sm:$0xff]  ;;  %976 = vmatpush.msrb.mxu3 %v2396_v21  ;;  %v2408_v21 = vld [vmem:[%s3825_s2 + $0x238] sm:$0xff] }
  0x39   : > { %233 = vst [vmem:[#allocation2 + $0xe8] sm:$0x3] %v2554_v2  ;;  %543 = vmatmul.f32.vlgmr.msra.gmra.mxu1 %v462_v25 }
  0x3a   : > { %234 = vst [vmem:[#allocation2 + $0xf0] sm:$0xff] %v2554_v2 }
  0x3b   : > { %235 = vst [vmem:[#allocation2 + $0xf8] sm:$0x3] %v2554_v2 }
  0x3c   : > { %236 = vst [vmem:[#allocation2 + $0x100] sm:$0xff] %v2554_v2 }
  0x3d   : > { %237 = vst [vmem:[#allocation2 + $0x108] sm:$0x3] %v2554_v2 }
  0x3e   : > { %238 = vst [vmem:[#allocation2 + $0x110] sm:$0xff] %v2554_v2 }
  0x3f   : > { %239 = vst [vmem:[#allocation2 + $0x118] sm:$0x3] %v2554_v2 }
  0x40   : > { %240 = vst [vmem:[#allocation2 + $0x120] sm:$0xff] %v2554_v2 }
  0x41   : > { %241 = vst [vmem:[#allocation2 + $0x128] sm:$0x3] %v2554_v2 }
  0x42   : > { %242 = vst [vmem:[#allocation2 + $0x130] sm:$0xff] %v2554_v2 }
  0x43   : > { %243 = vst [vmem:[#allocation2 + $0x138] sm:$0x3] %v2554_v2 }
  0x44   : > { %244 = vst [vmem:[#allocation2 + $0x140] sm:$0xff] %v2554_v2 }
  0x45   : > { %245 = vst [vmem:[#allocation2 + $0x148] sm:$0x3] %v2554_v2 }
  0x46   : > { %262 = vst [vmem:[#allocation2 + $0x1d0] sm:$0xff] %v2554_v2 }
  0x47   : > { %263 = vst [vmem:[#allocation2 + $0x1d8] sm:$0x3] %v2554_v2 }
  0x48   : > { %264 = vst [vmem:[#allocation2 + $0x1e0] sm:$0xff] %v2554_v2 }
  0x49   : > { %265 = vst [vmem:[#allocation2 + $0x1e8] sm:$0x3] %v2554_v2 }
  0x4a   : > { %266 = vst [vmem:[#allocation2 + $0x1f0] sm:$0xff] %v2554_v2 }
  0x4b   : > { %267 = vst [vmem:[#allocation2 + $0x1f8] sm:$0x3] %v2554_v2 }
  0x4c   : > { %268 = vst [vmem:[#allocation2 + $0x200] sm:$0xff] %v2554_v2  ;;  %v470_v26 = vld [vmem:[#allocation2 + $0x141] sm:$0xff] }
  0x4d   : > { %269 = vst [vmem:[#allocation2 + $0x208] sm:$0x3] %v2554_v2  ;;  %567 = vmatmul.f32.vlgmr.msra.gmra.mxu2 %v470_v26  ;;  %v2379_v26 = vld [vmem:[%s3825_s2 + $0x150] sm:$0xff] }
  0x4e   : > { %270 = vst [vmem:[#allocation2 + $0x210] sm:$0xff] %v2554_v2  ;;  %783 = vmatpush.msrb.mxu2 %v2379_v26  ;;  %v2407_v26 = vld [vmem:[%s3825_s2 + $0x230] sm:$0xff] }
  0x4f   : > { %271 = vst [vmem:[#allocation2 + $0x218] sm:$0x3] %v2554_v2 }
  0x50   : > { %272 = vst [vmem:[#allocation2 + $0x220] sm:$0xff] %v2554_v2  ;;  %v478_v29 = vld [vmem:[#allocation2 + $0x1e1] sm:$0xff] }
  0x51   : > { %273 = vst [vmem:[#allocation2 + $0x228] sm:$0x3] %v2554_v2  ;;  %591 = vmatmul.f32.vlgmr.msra.gmra.mxu3 %v478_v29  ;;  %v449_v29 = vld [vmem:[%s3825_s2 + $0x58] sm:$0xff] }
  0x52   : > { %274 = vst [vmem:[#allocation2 + $0x230] sm:$0xff] %v2554_v2  ;;  %620 = vmatpush.msrb.mxu1 %v449_v29 }
  0x53   : > { %275 = vst [vmem:[#allocation2 + $0x238] sm:$0x3] %v2554_v2 }
  0x54   : > { %276 = vst [vmem:[#allocation2 + $0x240] sm:$0xff] %v2554_v2 }
  0x55   : > { %277 = vst [vmem:[#allocation2 + $0x248] sm:$0x3] %v2554_v2 }
  0x56   : > { %278 = vst [vmem:[#allocation2 + $0x250] sm:$0xff] %v2554_v2 }
  0x57   : > { %279 = vst [vmem:[#allocation2 + $0x258] sm:$0x3] %v2554_v2 }
  0x58   : > { %280 = vst [vmem:[#allocation2 + $0x260] sm:$0xff] %v2554_v2 }
  0x59   : > { %281 = vst [vmem:[#allocation2 + $0x268] sm:$0x3] %v2554_v2 }
  0x5a   : > { %282 = vst [vmem:[#allocation2 + $0x270] sm:$0xff] %v2554_v2 }
  0x5b   : > { %283 = vst [vmem:[#allocation2 + $0x278] sm:$0x3] %v2554_v2 }
  0x84   : > { %v332_v34 = vpop.permute.xlu0 %331  ;;  %v330_v49 = vpop.permute.xlu1 %329 }
  0x85   : > { %v356_v37 = vsel %vm339_vm0, %v303_v30, %v332_v34  ;;  %v357_v38 = vsel %vm339_vm0, %v304_v31, %v332_v34  ;;  %v358_v39 = vsel %vm339_vm0, %v305_v32, %v332_v34  ;;  %v359_v41 = vsel %vm339_vm0, %v306_v33, %v332_v34  ;;  %v2395_v30 = vld [vmem:[%s3825_s2 + $0x1d0] sm:$0xff] }
  0x86   : > { %390 = vst.msk [vmem:[#allocation2 + $0x151] sm:$0xff] %vm373_vm1, %v356_v37  ;;  %v360_v45 = vsel %vm339_vm0, %v307_v35, %v332_v34  ;;  %v361_v48 = vsel %vm339_vm0, %v308_v36, %v332_v34  ;;  %v362_v53 = vsel %vm339_vm0, %v309_v40, %v332_v34  ;;  %v363_v57 = vsel %vm339_vm0, %v310_v44, %v332_v34  ;;  %v317_v31 = vld [vmem:[%s2737_s10 + $0xf0] sm:$0xff]  ;;  %v2378_v34 = vld [vmem:[%s3825_s2 + $0x148] sm:$0xff]  ;;  %v318_v35 = vld [vmem:[%s2737_s10 + $0xf8] sm:$0xff] }
  0x87   : > { %391 = vst.msk [vmem:[#allocation2 + $0x161] sm:$0xff] %vm373_vm1, %v357_v38  ;;  %v348_v60 = vsel %vm339_vm0, %v295_v50, %v330_v49  ;;  %v349_v62 = vsel %vm339_vm0, %v296_v54, %v330_v49  ;;  %v350_v0 = vsel %vm339_vm0, %v297_v58, %v330_v49  ;;  %v351_v3 = vsel %vm339_vm0, %v298_v59, %v330_v49  ;;  %v448_v37 = vld [vmem:[%s3825_s2 + $0x50] sm:$0xff]  ;;  %v2412_v38 = vld [vmem:[%s3825_s2 + $0x258] sm:$0xff]  ;;  %v287_v40 = vld [vmem:[%s2737_s10] sm:$0xff] }
  0x88   : > { %392 = vst.msk [vmem:[#allocation2 + $0x171] sm:$0xff] %vm373_vm1, %v358_v39  ;;  %v352_v7 = vsel %vm339_vm0, %v299_v61, %v330_v49  ;;  %v353_v10 = vsel %vm339_vm0, %v300_v63, %v330_v49  ;;  %v354_v15 = vsel %vm339_vm0, %v301_v1, %v330_v49  ;;  %v355_v19 = vsel %vm339_vm0, %v302_v6, %v330_v49  ;;  %v288_v49 = vld [vmem:[%s2737_s10 + $0x8] sm:$0xff]  ;;  %v2393_v50 = vld [vmem:[%s3825_s2 + $0x1c0] sm:$0xff]  ;;  %v293_v63 = vld [vmem:[%s2737_s10 + $0x30] sm:$0xff] }
  0x89   : > { %393 = vst.msk [vmem:[#allocation2 + $0x181] sm:$0xff] %vm373_vm1, %v359_v41  ;;  %977 = vmatpush.msrb.mxu3 %v2395_v30  ;;  %v2394_v41 = vld [vmem:[%s3825_s2 + $0x1c8] sm:$0xff]  ;;  %784 = vmatpush.msrb.mxu2 %v2378_v34  ;;  %v446_v54 = vld [vmem:[%s3825_s2 + $0x40] sm:$0xff]  ;;  %v2392_v1 = vld [vmem:[%s3825_s2 + $0x1b8] sm:$0xff] }
  0x8a   : > { %394 = vst.msk [vmem:[#allocation2 + $0x191] sm:$0xff] %vm373_vm1, %v360_v45  ;;  %1170 = vmatpush.msrb.mxu0 %v2412_v38  ;;  %621 = vmatpush.msrb.mxu1 %v448_v37  ;;  %v291_v58 = vld [vmem:[%s2737_s10 + $0x20] sm:$0xff]  ;;  %v2406_v34 = vld [vmem:[%s3825_s2 + $0x228] sm:$0xff]  ;;  %v440_v37 = vld [vmem:[%s3825_s2 + $0x10] sm:$0xff] }
  0x8b   : > { %395 = vst.msk [vmem:[#allocation2 + $0x1a1] sm:$0xff] %vm373_vm1, %v361_v48  ;;  %978 = vmatpush.msrb.mxu3 %v2394_v41  ;;  %785 = vmatpush.msrb.mxu2 %v2377_v42  ;;  %v439_v41 = vld [vmem:[%s3825_s2 + $0x8] sm:$0xff] }
  0x8c   : > { %396 = vst.msk [vmem:[#allocation2 + $0x1b1] sm:$0xff] %vm373_vm1, %v362_v53  ;;  %v2815_v11 = vpop.permute.xlu0 %333  ;;  %v2894_v44 = vpop.permute.xlu1 %327  ;;  %v289_v53 = vld [vmem:[%s2737_s10 + $0x10] sm:$0xff]  ;;  %622 = vmatpush.msrb.mxu1 %v447_v46  ;;  %1171 = vmatpush.msrb.mxu0 %v2411_v47  ;;  %v2370_v42 = vld [vmem:[%s3825_s2 + $0x108] sm:$0xff]  ;;  %v2369_v47 = vld [vmem:[%s3825_s2 + $0x100] sm:$0xff] }
  0x8d   : > { %397 = vst.msk [vmem:[#allocation2 + $0x1c1] sm:$0xff] %vm373_vm1, %v363_v57  ;;  %v2799_v4 = vld [vmem:[#allocation2 + $0x151] sm:$0xff]  ;;  %v364_v25 = vsel %vm339_vm0, %v311_v12, %v2815_v11  ;;  %v365_v28 = vsel %vm339_vm0, %v312_v16, %v2815_v11  ;;  %v366_v32 = vsel %vm339_vm0, %v313_v20, %v2815_v11  ;;  %v367_v36 = vsel %vm339_vm0, %v314_v23, %v2815_v11  ;;  %v2409_v12 = vld [vmem:[%s3825_s2 + $0x240] sm:$0xff]  ;;  %v2390_v20 = vld [vmem:[%s3825_s2 + $0x1a8] sm:$0xff] }
  0x8e   : > { %382 = vst.msk [vmem:[#allocation2 + $0xb1] sm:$0xff] %vm373_vm1, %v348_v60  ;;  %570 = vmatmul.f32.gmra.mxu2 %v2799_v4  ;;  %v368_v39 = vsel %vm339_vm0, %v315_v24, %v2815_v11  ;;  %v369_v43 = vsel %vm339_vm0, %v316_v27, %v2815_v11  ;;  %v2896_v45 = vld [vmem:[#allocation2 + $0x161] sm:$0xff]  ;;  %v370_v48 = vsel %vm339_vm0, %v317_v31, %v2815_v11 }
  0x8f   : > { %383 = vst.msk [vmem:[#allocation2 + $0xc1] sm:$0xff] %vm373_vm1, %v349_v62  ;;  %v371_v52 = vsel %vm339_vm0, %v318_v35, %v2815_v11  ;;  %v340_v56 = vsel %vm339_vm0, %v287_v40, %v2894_v44  ;;  %v341_v59 = vsel %vm339_vm0, %v288_v49, %v2894_v44  ;;  %979 = vmatpush.msrb.mxu3 %v2393_v50  ;;  %v292_v60 = vld [vmem:[%s2737_s10 + $0x28] sm:$0xff]  ;;  %v2391_v11 = vld [vmem:[%s3825_s2 + $0x1b0] sm:$0xff]  ;;  %v2373_v23 = vld [vmem:[%s3825_s2 + $0x120] sm:$0xff] }
  0x90   : > { %384 = vst.msk [vmem:[#allocation2 + $0xd1] sm:$0xff] %vm373_vm1, %v350_v0  ;;  %786 = vmatpush.msrb.mxu2 %v2376_v51  ;;  %v342_v61 = vsel %vm339_vm0, %v289_v53, %v2894_v44  ;;  %623 = vmatpush.msrb.mxu1 %v446_v54  ;;  %v343_v0 = vsel %vm339_vm0, %v290_v55, %v2894_v44  ;;  %v3002_v24 = vld [vmem:[#allocation2 + $0x181] sm:$0xff]  ;;  %v441_v35 = vld [vmem:[%s3825_s2 + $0x18] sm:$0xff]  ;;  %v2403_v54 = vld [vmem:[%s3825_s2 + $0x210] sm:$0xff] }
  0x91   : > { %385 = vst.msk [vmem:[#allocation2 + $0xe1] sm:$0xff] %vm373_vm1, %v351_v3  ;;  %v2410_v3 = vld [vmem:[%s3825_s2 + $0x248] sm:$0xff]  ;;  %v344_v6 = vsel %vm339_vm0, %v291_v58, %v2894_v44  ;;  %980 = vmatpush.msrb.mxu3 %v2392_v1  ;;  %v345_v9 = vsel %vm339_vm0, %v292_v60, %v2894_v44  ;;  %v346_v13 = vsel %vm339_vm0, %v293_v63, %v2894_v44  ;;  %v442_v27 = vld [vmem:[%s3825_s2 + $0x20] sm:$0xff]  ;;  %v3038_v38 = vld [vmem:[#allocation2 + $0x191] sm:$0xff] }
  0x92   : > { %386 = vst.msk [vmem:[#allocation2 + $0xf1] sm:$0xff] %vm373_vm1, %v352_v7  ;;  %1172 = vmatpush.msrb.mxu0 %v2410_v3  ;;  %v445_v7 = vld [vmem:[%s3825_s2 + $0x38] sm:$0xff]  ;;  %787 = vmatpush.msrb.mxu2 %v2375_v8  ;;  %v347_v16 = vsel %vm339_vm0, %v294_v5, %v2894_v44  ;;  %v2405_v40 = vld [vmem:[%s3825_s2 + $0x220] sm:$0xff]  ;;  %v2386_v49 = vld [vmem:[%s3825_s2 + $0x188] sm:$0xff] }
  0x93   : > { %387 = vst.msk [vmem:[#allocation2 + $0x101] sm:$0xff] %vm373_vm1, %v353_v10  ;;  %v2960_v10 = vld [vmem:[#allocation2 + $0x171] sm:$0xff]  ;;  %624 = vmatpush.msrb.mxu1 %v445_v7  ;;  %981 = vmatpush.msrb.mxu3 %v2391_v11  ;;  %v2385_v51 = vld [vmem:[%s3825_s2 + $0x180] sm:$0xff]  ;;  %v2402_v55 = vld [vmem:[%s3825_s2 + $0x208] sm:$0xff] }
  0x94   : > { %388 = vst.msk [vmem:[#allocation2 + $0x111] sm:$0xff] %vm373_vm1, %v354_v15  ;;  %v2374_v15 = vld [vmem:[%s3825_s2 + $0x128] sm:$0xff]  ;;  %1173 = vmatpush.msrb.mxu0 %v2409_v12  ;;  %v2404_v50 = vld [vmem:[%s3825_s2 + $0x218] sm:$0xff]  ;;  %v2447_v7 = vld [vmem:[%s3825_s2 + $0x370] sm:$0xff] }
  0x95   : > { %389 = vst.msk [vmem:[#allocation2 + $0x121] sm:$0xff] %vm373_vm1, %v355_v19  ;;  %v2865_v33 = vld [vmem:[#allocation2 + $0xb1] sm:$0xff]  ;;  %625 = vmatpush.msrb.mxu1 %v444_v14  ;;  %788 = vmatpush.msrb.mxu2 %v2374_v15  ;;  %v3077_v53 = vld [vmem:[#allocation2 + $0x1a1] sm:$0xff] }
  0x96   : > { %398 = vst.msk [vmem:[#allocation2 + $0x1f1] sm:$0xff] %vm373_vm1, %v364_v25  ;;  %546 = vmatmul.f32.gmra.mxu1 %v2865_v33  ;;  %573 = vmatmul.f32.gmra.mxu2 %v2896_v45  ;;  %v2926_v57 = vld [vmem:[#allocation2 + $0xc1] sm:$0xff]  ;;  %v3101_v63 = vld [vmem:[#allocation2 + $0x1b1] sm:$0xff] }
  0x97   : > { %399 = vst.msk [vmem:[#allocation2 + $0x201] sm:$0xff] %vm373_vm1, %v365_v28  ;;  %v2986_v18 = vld [vmem:[#allocation2 + $0xd1] sm:$0xff]  ;;  %1174 = vmatpush.msrb.mxu0 %v2408_v21  ;;  %982 = vmatpush.msrb.mxu3 %v2390_v20  ;;  %v2389_v25 = vld [vmem:[%s3825_s2 + $0x1a0] sm:$0xff] }
  0x98   : > { %400 = vst.msk [vmem:[#allocation2 + $0x211] sm:$0xff] %vm373_vm1, %v366_v32  ;;  %626 = vmatpush.msrb.mxu1 %v443_v22  ;;  %v2372_v28 = vld [vmem:[%s3825_s2 + $0x118] sm:$0xff]  ;;  %789 = vmatpush.msrb.mxu2 %v2373_v23  ;;  %v3019_v30 = vld [vmem:[#allocation2 + $0xe1] sm:$0xff]  ;;  %v2463_v11 = vld [vmem:[%s3825_s2 + $0x3f0] sm:$0xff] }
  0x99   : > { %401 = vst.msk [vmem:[#allocation2 + $0x221] sm:$0xff] %vm373_vm1, %v367_v36  ;;  %1175 = vmatpush.msrb.mxu0 %v2407_v26  ;;  %983 = vmatpush.msrb.mxu3 %v2389_v25  ;;  %v2388_v32 = vld [vmem:[%s3825_s2 + $0x198] sm:$0xff]  ;;  %v2371_v36 = vld [vmem:[%s3825_s2 + $0x110] sm:$0xff]  ;;  %v729_v5 = vld [vmem:[#allocation2 + $0x2] sm:$0xff] }
  0x9a   : > { %402 = vst.msk [vmem:[#allocation2 + $0x231] sm:$0xff] %vm373_vm1, %v368_v39  ;;  %627 = vmatpush.msrb.mxu1 %v442_v27  ;;  %790 = vmatpush.msrb.mxu2 %v2372_v28  ;;  %v2387_v39 = vld [vmem:[%s3825_s2 + $0x190] sm:$0xff]  ;;  %v2462_v22 = vld [vmem:[%s3825_s2 + $0x3e8] sm:$0xff]  ;;  %v2445_v27 = vld [vmem:[%s3825_s2 + $0x360] sm:$0xff] }
  0x9b   : > { %403 = vst.msk [vmem:[#allocation2 + $0x241] sm:$0xff] %vm373_vm1, %v369_v43  ;;  %1176 = vmatpush.msrb.mxu0 %v2406_v34  ;;  %984 = vmatpush.msrb.mxu3 %v2388_v32  ;;  %v438_v43 = vld [vmem:[%s3825_s2] sm:$0xff]  ;;  %v3058_v46 = vld [vmem:[#allocation2 + $0xf1] sm:$0xff]  ;;  %v2430_v23 = vld [vmem:[%s3825_s2 + $0x2e8] sm:$0xff] }
  0x9c   : > { %404 = vst.msk [vmem:[#allocation2 + $0x251] sm:$0xff] %vm373_vm1, %v370_v48  ;;  %628 = vmatpush.msrb.mxu1 %v441_v35  ;;  %791 = vmatpush.msrb.mxu2 %v2371_v36  ;;  %v3106_v1 = vld [vmem:[#allocation2 + $0x111] sm:$0xff]  ;;  %v2429_v32 = vld [vmem:[%s3825_s2 + $0x2e0] sm:$0xff] }
  0x9d   : > { %405 = vst.msk [vmem:[#allocation2 + $0x261] sm:$0xff] %vm373_vm1, %v371_v52  ;;  %v479_v62 = vld [vmem:[#allocation2 + $0x1f1] sm:$0xff]  ;;  %1177 = vmatpush.msrb.mxu0 %v2405_v40  ;;  %985 = vmatpush.msrb.mxu3 %v2387_v39  ;;  %v2477_v36 = vld [vmem:[%s3825_s2 + $0x460] sm:$0xff] }
  0x9e   : > { %374 = vst.msk [vmem:[#allocation2 + $0x11] sm:$0xff] %vm373_vm1, %v340_v56  ;;  %549 = vmatmul.f32.gmra.mxu1 %v2926_v57  ;;  %594 = vmatmul.f32.gmra.mxu3 %v479_v62  ;;  %v480_v19 = vld [vmem:[#allocation2 + $0x201] sm:$0xff]  ;;  %v2448_v52 = vld [vmem:[%s3825_s2 + $0x378] sm:$0xff]  ;;  %v2431_v12 = vld [vmem:[%s3825_s2 + $0x2f0] sm:$0xff] }
  0x9f   : > { %375 = vst.msk [vmem:[#allocation2 + $0x21] sm:$0xff] %vm373_vm1, %v341_v59  ;;  %576 = vmatmul.f32.gmra.mxu2 %v2960_v10  ;;  %v481_v31 = vld [vmem:[#allocation2 + $0x211] sm:$0xff]  ;;  %629 = vmatpush.msrb.mxu1 %v440_v37  ;;  %v2401_v56 = vld [vmem:[%s3825_s2 + $0x200] sm:$0xff] }
  0xa0   : > { %376 = vst.msk [vmem:[#allocation2 + $0x31] sm:$0xff] %vm373_vm1, %v342_v61  ;;  %792 = vmatpush.msrb.mxu2 %v2370_v42  ;;  %v482_v48 = vld [vmem:[#allocation2 + $0x221] sm:$0xff]  ;;  %986 = vmatpush.msrb.mxu3 %v2386_v49  ;;  %v2464_v61 = vld [vmem:[%s3825_s2 + $0x3f8] sm:$0xff] }
  0xa1   : > { %377 = vst.msk [vmem:[#allocation2 + $0x41] sm:$0xff] %vm373_vm1, %v343_v0  ;;  %630 = vmatpush.msrb.mxu1 %v439_v41  ;;  %1178 = vmatpush.msrb.mxu0 %v2404_v50  ;;  %v3091_v59 = vld [vmem:[#allocation2 + $0x101] sm:$0xff]  ;;  %v483_v60 = vld [vmem:[#allocation2 + $0x231] sm:$0xff] }
  0xa2   : > { %378 = vst.msk [vmem:[#allocation2 + $0x51] sm:$0xff] %vm373_vm1, %v344_v6  ;;  %793 = vmatpush.msrb.mxu2 %v2369_v47  ;;  %987 = vmatpush.msrb.mxu3 %v2385_v51  ;;  %v2432_v62 = vld [vmem:[%s3825_s2 + $0x2f8] sm:$0xff]  ;;  %v484_v3 = vld [vmem:[#allocation2 + $0x241] sm:$0xff]  ;;  %v2443_v51 = vld [vmem:[%s3825_s2 + $0x350] sm:$0xff] }
  0xa3   : > { %379 = vst.msk [vmem:[#allocation2 + $0x61] sm:$0xff] %vm373_vm1, %v345_v9  ;;  %631 = vmatpush.msrb.mxu1 %v438_v43  ;;  %1179 = vmatpush.msrb.mxu0 %v2403_v54  ;;  %v2480_v6 = vld [vmem:[%s3825_s2 + $0x478] sm:$0xff]  ;;  %v737_v47 = vld [vmem:[#allocation2 + $0xa2] sm:$0xff]  ;;  %v2459_v54 = vld [vmem:[%s3825_s2 + $0x3d0] sm:$0xff] }
  0xa4   : > { %380 = vst.msk [vmem:[#allocation2 + $0x71] sm:$0xff] %vm373_vm1, %v346_v13  ;;  %1555 = vmatpush.msra.mxu2 %v2448_v52  ;;  %1749 = vmatpush.msra.mxu3 %v2464_v61  ;;  %v485_v9 = vld [vmem:[#allocation2 + $0x251] sm:$0xff] }
  0xa5   : > { %381 = vst.msk [vmem:[#allocation2 + $0x81] sm:$0xff] %vm373_vm1, %v347_v16  ;;  %v2984_v17 = vld [vmem:[#allocation2 + $0x11] sm:$0xff]  ;;  %1180 = vmatpush.msrb.mxu0 %v2402_v55  ;;  %1360 = vmatpush.msra.mxu1 %v2432_v62 }
  0xa6   : > { %522 = vmatmul.f32.gmra.mxu0 %v2984_v17  ;;  %552 = vmatmul.f32.gmra.mxu1 %v2986_v18  ;;  %v3017_v29 = vld [vmem:[#allocation2 + $0x21] sm:$0xff]  ;;  %v730_v13 = vld [vmem:[#allocation2 + $0x12] sm:$0xff] }
  0xa7   : > { %597 = vmatmul.f32.gmra.mxu3 %v480_v19  ;;  %579 = vmatmul.f32.gmra.mxu2 %v3002_v24  ;;  %v3056_v44 = vld [vmem:[#allocation2 + $0x31] sm:$0xff]  ;;  %v2446_v19 = vld [vmem:[%s3825_s2 + $0x368] sm:$0xff]  ;;  %v3135_v21 = vld [vmem:[#allocation2 + $0x20] sm:$0xff] }
  0xa8   : > { %v3089_v58 = vld [vmem:[#allocation2 + $0x41] sm:$0xff]  ;;  %1181 = vmatpush.msrb.mxu0 %v2401_v56  ;;  %1556 = vmatpush.msra.mxu2 %v2447_v7  ;;  %v407_v15 = vld [vmem:[#allocation2 + $0x10] sm:$0xff]  ;;  %v2444_v37 = vld [vmem:[%s3825_s2 + $0x358] sm:$0xff] }
  0xa9   : > { %v3104_v0 = vld [vmem:[#allocation2 + $0x51] sm:$0xff]  ;;  %1361 = vmatpush.msra.mxu1 %v2431_v12  ;;  %1750 = vmatpush.msra.mxu3 %v2463_v11  ;;  %v731_v20 = vld [vmem:[#allocation2 + $0x22] sm:$0xff] }
  0xaa   : > { %1943 = vmatpush.msra.mxu0 %v2480_v6  ;;  %v3116_v8 = vld [vmem:[#allocation2 + $0x61] sm:$0xff]  ;;  %v2479_v16 = vld [vmem:[%s3825_s2 + $0x470] sm:$0xff]  ;;  %1557 = vmatpush.msra.mxu2 %v2446_v19  ;;  %v2460_v41 = vld [vmem:[%s3825_s2 + $0x3d8] sm:$0xff] }
  0xab   : > { %v3126_v14 = vld [vmem:[#allocation2 + $0x71] sm:$0xff]  ;;  %1362 = vmatpush.msra.mxu1 %v2430_v23  ;;  %1751 = vmatpush.msra.mxu3 %v2462_v22  ;;  %v733_v28 = vld [vmem:[#allocation2 + $0x42] sm:$0xff] }
  0xac   : > { %1944 = vmatpush.msra.mxu0 %v2479_v16  ;;  %v732_v25 = vld [vmem:[#allocation2 + $0x32] sm:$0xff]  ;;  %1558 = vmatpush.msra.mxu2 %v2445_v27  ;;  %v735_v39 = vld [vmem:[#allocation2 + $0x62] sm:$0xff] }
  0xad   : > { %v3146_v26 = vld [vmem:[#allocation2 + $0x30] sm:$0xff]  ;;  %1363 = vmatpush.msra.mxu1 %v2429_v32  ;;  %v412_v40 = vld [vmem:[#allocation2 + $0x60] sm:$0xff]  ;;  %v2428_v42 = vld [vmem:[%s3825_s2 + $0x2d8] sm:$0xff] }
  0xae   : > { %525 = vmatmul.f32.gmra.mxu0 %v3017_v29  ;;  %555 = vmatmul.f32.gmra.mxu1 %v3019_v30  ;;  %v734_v34 = vld [vmem:[#allocation2 + $0x52] sm:$0xff]  ;;  %v930_v52 = vld [vmem:[#allocation2 + $0x80] sm:$0xff]  ;;  %v2442_v7 = vld [vmem:[%s3825_s2 + $0x348] sm:$0xff] }
  0xaf   : > { %600 = vmatmul.f32.gmra.mxu3 %v481_v31  ;;  %582 = vmatmul.f32.gmra.mxu2 %v3038_v38  ;;  %v410_v31 = vld [vmem:[#allocation2 + $0x40] sm:$0xff]  ;;  %v411_v35 = vld [vmem:[#allocation2 + $0x50] sm:$0xff]  ;;  %v2458_v11 = vld [vmem:[%s3825_s2 + $0x3c8] sm:$0xff] }
  0xb0   : > { %1559 = vmatpush.msra.mxu2 %v2444_v37  ;;  %1364 = vmatpush.msra.mxu1 %v2428_v42  ;;  %v736_v43 = vld [vmem:[#allocation2 + $0x72] sm:$0xff]  ;;  %v1124_v61 = vld [vmem:[#allocation2 + $0x81] sm:$0xff] }
  0xb1   : > { %v2427_v55 = vld [vmem:[%s3825_s2 + $0x2d0] sm:$0xff]  ;;  %v2426_v12 = vld [vmem:[%s3825_s2 + $0x2c8] sm:$0xff]  ;;  %v2441_v27 = vld [vmem:[%s3825_s2 + $0x340] sm:$0xff] }
  0xb2   : > { %1560 = vmatpush.msra.mxu2 %v2443_v51  ;;  %1365 = vmatpush.msra.mxu1 %v2427_v55  ;;  %v738_v56 = vld [vmem:[#allocation2 + $0xb2] sm:$0xff]  ;;  %v741_v22 = vld [vmem:[#allocation2 + $0xe2] sm:$0xff] }
  0xb3   : > { %v2475_v62 = vld [vmem:[%s3825_s2 + $0x450] sm:$0xff]  ;;  %v2424_v51 = vld [vmem:[%s3825_s2 + $0x2b8] sm:$0xff] }
  0xb4   : > { %1561 = vmatpush.msra.mxu2 %v2442_v7  ;;  %1366 = vmatpush.msra.mxu1 %v2426_v12  ;;  %v417_v19 = vld [vmem:[#allocation2 + $0xd0] sm:$0xff] }
  0xb5   : > { %v742_v32 = vld [vmem:[#allocation2 + $0xf2] sm:$0xff] }
  0xb6   : > { %528 = vmatmul.f32.gmra.mxu0 %v3056_v44  ;;  %558 = vmatmul.f32.gmra.mxu1 %v3058_v46  ;;  %v3182_v49 = vpop.f32.mrf.mxu1  ;;  %v419_v37 = vld [vmem:[#allocation2 + $0xf0] sm:$0xff] }
  0xb7   : > { %603 = vmatmul.f32.gmra.mxu3 %v482_v48  ;;  %585 = vmatmul.f32.gmra.mxu2 %v3077_v53  ;;  %v2476_v48 = vld [vmem:[%s3825_s2 + $0x458] sm:$0xff] }
  0xb8   : > { %1562 = vmatpush.msra.mxu2 %v2441_v27  ;;  %v2423_v27 = vld [vmem:[%s3825_s2 + $0x2b0] sm:$0xff] }
  0xbe   : > { %531 = vmatmul.f32.gmra.mxu0 %v3089_v58  ;;  %561 = vmatmul.f32.gmra.mxu1 %v3091_v59 }
  0xbf   : > { %606 = vmatmul.f32.gmra.mxu3 %v483_v60  ;;  %588 = vmatmul.f32.gmra.mxu2 %v3101_v63 }
  0xc6   : > { %534 = vmatmul.f32.gmra.mxu0 %v3104_v0  ;;  %564 = vmatmul.f32.gmra.mxu1 %v3106_v1 }
  0xc7   : > { %609 = vmatmul.f32.gmra.mxu3 %v484_v3  ;;  %794 = vmatmul.f32.vlgmr.msrb.gmra.mxu2 %v729_v5  ;;  %v739_v3 = vld [vmem:[#allocation2 + $0xc2] sm:$0xff]  ;;  %v3206_v5 = vpop.f32.mrf.mxu0 }
  0xce   : > { %537 = vmatmul.f32.gmra.mxu0 %v3116_v8  ;;  %632 = vmatmul.f32.vlgmr.msrb.gmra.mxu1 %v2554_v2 }
  0xcf   : > { %612 = vmatmul.f32.gmra.mxu3 %v485_v9  ;;  %797 = vmatmul.f32.gmra.mxu2 %v730_v13  ;;  %v416_v9 = vld [vmem:[#allocation2 + $0xc0] sm:$0xff]  ;;  %v740_v13 = vld [vmem:[#allocation2 + $0xd2] sm:$0xff] }
  0xd0   : > { %v3184_v50 = vpop.f32.mrf.mxu2 }
  0xd6   : > { %540 = vmatmul.f32.gmra.mxu0 %v3126_v14  ;;  %635 = vmatmul.f32.gmra.mxu1 %v407_v15 }
  0xd7   : > { %988 = vmatmul.f32.vlgmr.msrb.gmra.mxu3 %v407_v15  ;;  %800 = vmatmul.f32.gmra.mxu2 %v731_v20  ;;  %v2474_v20 = vld [vmem:[%s3825_s2 + $0x448] sm:$0xff] }
  0xde   : > { %1182 = vmatmul.f32.vlgmr.msrb.gmra.mxu0 %v2984_v17  ;;  %638 = vmatmul.f32.gmra.mxu1 %v3135_v21  ;;  %v2478_v17 = vld [vmem:[%s3825_s2 + $0x468] sm:$0xff] }
  0xdf   : > { %991 = vmatmul.f32.gmra.mxu3 %v3135_v21  ;;  %803 = vmatmul.f32.gmra.mxu2 %v732_v25 }
  0xe0   : > { %1945 = vmatpush.msra.mxu0 %v2478_v17 }
  0xe2   : > { %1946 = vmatpush.msra.mxu0 %v2477_v36 }
  0xe4   : > { %1947 = vmatpush.msra.mxu0 %v2476_v48  ;;  %v2456_v48 = vld [vmem:[%s3825_s2 + $0x3b8] sm:$0xff] }
  0xe6   : > { %1185 = vmatmul.f32.gmra.mxu0 %v3017_v29  ;;  %641 = vmatmul.f32.gmra.mxu1 %v3146_v26  ;;  %v2461_v29 = vld [vmem:[%s3825_s2 + $0x3e0] sm:$0xff] }
  0xe7   : > { %994 = vmatmul.f32.gmra.mxu3 %v3146_v26  ;;  %806 = vmatmul.f32.gmra.mxu2 %v733_v28  ;;  %v418_v28 = vld [vmem:[#allocation2 + $0xe0] sm:$0xff] }
  0xe8   : > { %1752 = vmatpush.msra.mxu3 %v2461_v29  ;;  %1948 = vmatpush.msra.mxu0 %v2475_v62  ;;  %v2425_v29 = vld [vmem:[%s3825_s2 + $0x2c0] sm:$0xff]  ;;  %v2472_v62 = vld [vmem:[%s3825_s2 + $0x438] sm:$0xff] }
  0xe9   : > { %1367 = vmatpush.msra.mxu1 %v2425_v29 }
  0xea   : > { %1753 = vmatpush.msra.mxu3 %v2460_v41  ;;  %1949 = vmatpush.msra.mxu0 %v2474_v20 }
  0xeb   : > { %1368 = vmatpush.msra.mxu1 %v2424_v51 }
  0xec   : > { %1754 = vmatpush.msra.mxu3 %v2459_v54 }
  0xed   : > { %1369 = vmatpush.msra.mxu1 %v2423_v27 }
  0xee   : > { %1188 = vmatmul.f32.gmra.mxu0 %v3056_v44  ;;  %644 = vmatmul.f32.gmra.mxu1 %v410_v31  ;;  %v413_v44 = vld [vmem:[#allocation2 + $0x70] sm:$0xff] }
  0xef   : > { %997 = vmatmul.f32.gmra.mxu3 %v410_v31  ;;  %809 = vmatmul.f32.gmra.mxu2 %v734_v34  ;;  %v2457_v31 = vld [vmem:[%s3825_s2 + $0x3c0] sm:$0xff] }
  0xf0   : > { %1755 = vmatpush.msra.mxu3 %v2458_v11  ;;  %v2439_v11 = vld [vmem:[%s3825_s2 + $0x330] sm:$0xff] }
  0xf2   : > { %1756 = vmatpush.msra.mxu3 %v2457_v31 }
  0xf4   : > { %1757 = vmatpush.msra.mxu3 %v2456_v48 }
  0xf6   : > { %1191 = vmatmul.f32.gmra.mxu0 %v3089_v58  ;;  %647 = vmatmul.f32.gmra.mxu1 %v411_v35 }
  0xf7   : > { %1000 = vmatmul.f32.gmra.mxu3 %v411_v35  ;;  %812 = vmatmul.f32.gmra.mxu2 %v735_v39  ;;  %v2473_v39 = vld [vmem:[%s3825_s2 + $0x440] sm:$0xff] }
  0xf8   : > { %1950 = vmatpush.msra.mxu0 %v2473_v39  ;;  %v423_v39 = vld [vmem:[#allocation2 + $0x150] sm:$0xff] }
  0xfa   : > { %1951 = vmatpush.msra.mxu0 %v2472_v62 }
  0xfe   : > { %1194 = vmatmul.f32.gmra.mxu0 %v3104_v0  ;;  %650 = vmatmul.f32.gmra.mxu1 %v412_v40  ;;  %v3204_v0 = vpop.f32.mrf.mxu3 }
  0xff   : > { %1003 = vmatmul.f32.gmra.mxu3 %v412_v40  ;;  %815 = vmatmul.f32.gmra.mxu2 %v736_v43  ;;  %v743_v40 = vld [vmem:[#allocation2 + $0x102] sm:$0xff] }
 0x106   : > { %1197 = vmatmul.f32.gmra.mxu0 %v3116_v8  ;;  %653 = vmatmul.f32.gmra.mxu1 %v413_v44 }
 0x107   : > { %1006 = vmatmul.f32.gmra.mxu3 %v413_v44  ;;  %818 = vmatmul.f32.gmra.mxu2 %v737_v47  ;;  %v2440_v44 = vld [vmem:[%s3825_s2 + $0x338] sm:$0xff]  ;;  %v420_v47 = vld [vmem:[#allocation2 + $0x100] sm:$0xff] }
 0x108   : > { %1563 = vmatpush.msra.mxu2 %v2440_v44  ;;  %v2471_v44 = vld [vmem:[%s3825_s2 + $0x430] sm:$0xff] }
 0x109   : > { %1952 = vmatpush.msra.mxu0 %v2471_v44 }
 0x10a   : > { %1564 = vmatpush.msra.mxu2 %v2439_v11 }
 0x10e   : > { %1200 = vmatmul.f32.gmra.mxu0 %v3126_v14  ;;  %656 = vmatmul.f32.gmra.mxu1 %v2554_v2  ;;  %v415_v2 = vld [vmem:[#allocation2 + $0xb0] sm:$0xff] }
 0x10f   : > { %1009 = vmatmul.f32.gmra.mxu3 %v930_v52  ;;  %821 = vmatmul.f32.gmra.mxu2 %v738_v56  ;;  %v744_v52 = vld [vmem:[#allocation2 + $0x112] sm:$0xff] }
 0x111   : > { %v3199_v60 = vpop.f32.mrf.mxu2 }
 0x113   : > { %v3197_v58 = vpop.f32.mrf.mxu1 }
 0x116   : > { %1203 = vmatmul.f32.gmra.mxu0 %v1124_v61  ;;  %659 = vmatmul.f32.gmra.mxu1 %v415_v2  ;;  %v421_v61 = vld [vmem:[#allocation2 + $0x110] sm:$0xff] }
 0x117   : > { %1012 = vmatmul.f32.gmra.mxu3 %v415_v2  ;;  %824 = vmatmul.f32.gmra.mxu2 %v739_v3  ;;  %v745_v2 = vld [vmem:[#allocation2 + $0x142] sm:$0xff] }
 0x119   : > { %v3213_v8 = vpop.f32.mrf.mxu2 }
 0x11b   : > { %v3208_v6 = vpop.f32.mrf.mxu1 }
 0x11e   : > { %1206 = vmatmul.f32.gmra.mxu0 %v2865_v33  ;;  %662 = vmatmul.f32.gmra.mxu1 %v416_v9 }
 0x11f   : > { %1015 = vmatmul.f32.gmra.mxu3 %v416_v9  ;;  %827 = vmatmul.f32.gmra.mxu2 %v740_v13  ;;  %v3303_v13 = vld [vmem:[#allocation2] sm:$0xff] }
 0x121   : > { %v3222_v14 = vpop.f32.mrf.mxu3 }
 0x122   : > { %v3228_v33 = vpop.f32.mrf.mxu2 }
 0x123   : > { %v3224_v15 = vpop.f32.mrf.mxu0  ;;  %v3226_v16 = vpop.f32.mrf.mxu1 }
 0x126   : > { %1209 = vmatmul.f32.gmra.mxu0 %v2926_v57  ;;  %665 = vmatmul.f32.gmra.mxu1 %v417_v19 }
 0x127   : > { %1018 = vmatmul.f32.gmra.mxu3 %v417_v19  ;;  %830 = vmatmul.f32.gmra.mxu2 %v741_v22  ;;  %v938_v19 = vld [vmem:[#allocation2 + $0x120] sm:$0xff]  ;;  %v2455_v22 = vld [vmem:[%s3825_s2 + $0x3b0] sm:$0xff] }
 0x128   : > { %1758 = vmatpush.msra.mxu3 %v2455_v22 }
 0x12a   : > { %v3234_v23 = vpop.f32.mrf.mxu3  ;;  %v3243_v57 = vpop.f32.mrf.mxu2 }
 0x12b   : > { %v3236_v25 = vpop.f32.mrf.mxu0  ;;  %v3238_v17 = vpop.f32.mrf.mxu1 }
 0x12e   : > { %1212 = vmatmul.f32.gmra.mxu0 %v2986_v18  ;;  %668 = vmatmul.f32.gmra.mxu1 %v418_v28 }
 0x12f   : > { %1021 = vmatmul.f32.gmra.mxu3 %v418_v28  ;;  %833 = vmatmul.f32.gmra.mxu2 %v742_v32 }
 0x132   : > { %v3252_v34 = vpop.f32.mrf.mxu3  ;;  %v3258_v18 = vpop.f32.mrf.mxu2 }
 0x133   : > { %v3254_v35 = vpop.f32.mrf.mxu0  ;;  %v3256_v36 = vpop.f32.mrf.mxu1 }
 0x136   : > { %1215 = vmatmul.f32.gmra.mxu0 %v3019_v30  ;;  %671 = vmatmul.f32.gmra.mxu1 %v419_v37 }
 0x137   : > { %1024 = vmatmul.f32.gmra.mxu3 %v419_v37  ;;  %836 = vmatmul.f32.gmra.mxu2 %v743_v40  ;;  %v1132_v37 = vld [vmem:[#allocation2 + $0x121] sm:$0xff] }
 0x13a   : > { %v3264_v41 = vpop.f32.mrf.mxu3  ;;  %v3273_v30 = vpop.f32.mrf.mxu2 }
 0x13b   : > { %v3266_v42 = vpop.f32.mrf.mxu0  ;;  %v3268_v43 = vpop.f32.mrf.mxu1 }
 0x13e   : > { %1218 = vmatmul.f32.gmra.mxu0 %v3058_v46  ;;  %674 = vmatmul.f32.gmra.mxu1 %v420_v47 }
 0x13f   : > { %1027 = vmatmul.f32.gmra.mxu3 %v420_v47  ;;  %839 = vmatmul.f32.gmra.mxu2 %v744_v52  ;;  %v747_v47 = vld [vmem:[#allocation2 + $0x162] sm:$0xff] }
 0x142   : > { %v3282_v54 = vpop.f32.mrf.mxu3  ;;  %v3288_v46 = vpop.f32.mrf.mxu2 }
 0x143   : > { %v3284_v55 = vpop.f32.mrf.mxu0  ;;  %v3286_v56 = vpop.f32.mrf.mxu1 }
 0x146   : > { %1221 = vmatmul.f32.gmra.mxu0 %v3091_v59  ;;  %677 = vmatmul.f32.gmra.mxu1 %v421_v61 }
 0x147   : > { %1030 = vmatmul.f32.gmra.mxu3 %v421_v61  ;;  %842 = vmatmul.f32.gmra.mxu2 %v745_v2 }
 0x14a   : > { %v3294_v3 = vpop.f32.mrf.mxu3  ;;  %v795_v12 = vpop.f32.mrf.mxu2 }
 0x14b   : > { %v3296_v7 = vpop.f32.mrf.mxu0  ;;  %v633_v9 = vpop.f32.mrf.mxu1 }
 0x14c   : > { %v634_v59 = vadd.f32 %v633_v9, %v3206_v5  ;;  %v746_v5 = vld [vmem:[#allocation2 + $0x152] sm:$0xff]  ;;  %v3324_v9 = vld [vmem:[#allocation2 + $0x160] sm:$0xff] }
 0x14e   : > { %1224 = vmatmul.f32.gmra.mxu0 %v3106_v1  ;;  %680 = vmatmul.f32.gmra.mxu1 %v3303_v13  ;;  %v891_v20 = vadd.f32 %v795_v12, %v634_v59  ;;  %v2454_v59 = vld [vmem:[%s3825_s2 + $0x3a8] sm:$0xff] }
 0x14f   : > { %1033 = vmatmul.f32.gmra.mxu3 %v938_v19  ;;  %845 = vmatmul.f32.gmra.mxu2 %v746_v5  ;;  %v2422_v12 = vld [vmem:[%s3825_s2 + $0x2a8] sm:$0xff] }
 0x150   : > { %1370 = vmatpush.msra.mxu1 %v2422_v12  ;;  %1759 = vmatpush.msra.mxu3 %v2454_v59 }
 0x152   : > { %v3312_v1 = vpop.f32.mrf.mxu3  ;;  %v798_v32 = vpop.f32.mrf.mxu2 }
 0x153   : > { %v3314_v28 = vpop.f32.mrf.mxu0  ;;  %v636_v31 = vpop.f32.mrf.mxu1 }
 0x154   : > { %v637_v29 = vadd.f32 %v636_v31, %v3224_v15  ;;  %v2438_v15 = vld [vmem:[%s3825_s2 + $0x328] sm:$0xff]  ;;  %v3338_v31 = vld [vmem:[#allocation2 + $0x170] sm:$0xff] }
 0x155   : > { %1565 = vmatpush.msra.mxu2 %v2438_v15 }
 0x156   : > { %1227 = vmatmul.f32.gmra.mxu0 %v1132_v37  ;;  %683 = vmatmul.f32.gmra.mxu1 %v423_v39  ;;  %v892_v40 = vadd.f32 %v798_v32, %v637_v29  ;;  %v2470_v32 = vld [vmem:[%s3825_s2 + $0x428] sm:$0xff] }
 0x157   : > { %1036 = vmatmul.f32.gmra.mxu3 %v423_v39  ;;  %848 = vmatmul.f32.gmra.mxu2 %v747_v47  ;;  %v749_v37 = vld [vmem:[#allocation2 + $0x182] sm:$0xff] }
 0x158   : > { %1953 = vmatpush.msra.mxu0 %v2470_v32 }
 0x15a   : > { %v989_v48 = vpop.f32.mrf.mxu3  ;;  %v801_v62 = vpop.f32.mrf.mxu2 }
 0x15b   : > { %v1183_v51 = vpop.f32.mrf.mxu0  ;;  %v1085_v52 = vadd.f32 %v989_v48, %v891_v20  ;;  %v639_v61 = vpop.f32.mrf.mxu1 }
 0x15c   : > { %v640_v2 = vadd.f32 %v639_v61, %v3236_v25  ;;  %v748_v25 = vld [vmem:[#allocation2 + $0x172] sm:$0xff]  ;;  %v426_v61 = vld [vmem:[#allocation2 + $0x180] sm:$0xff] }
 0x15d   : > { %v3354_v15 = vadd.f32 %v1183_v51, %v1085_v52 }
 0x15e   : > { %1230 = vmatmul.f32.gmra.mxu0 %v2799_v4  ;;  %686 = vmatmul.f32.gmra.mxu1 %v3324_v9  ;;  %v893_v11 = vadd.f32 %v801_v62, %v640_v2  ;;  %v2453_v62 = vld [vmem:[%s3825_s2 + $0x3a0] sm:$0xff] }
 0x15f   : > { %1039 = vmatmul.f32.gmra.mxu3 %v3324_v9  ;;  %851 = vmatmul.f32.gmra.mxu2 %v748_v25 }
 0x160   : > { %1760 = vmatpush.msra.mxu3 %v2453_v62 }
 0x162   : > { %v992_v19 = vpop.f32.mrf.mxu3  ;;  %v804_v5 = vpop.f32.mrf.mxu2 }
 0x163   : > { %v3335_v20 = vpop.f32.mrf.mxu0  ;;  %v1086_v4 = vadd.f32 %v992_v19, %v892_v40  ;;  %v642_v22 = vpop.f32.mrf.mxu1  ;;  %v427_v19 = vld [vmem:[#allocation2 + $0x190] sm:$0xff] }
 0x164   : > { %v643_v27 = vadd.f32 %v642_v22, %v3254_v35 }
 0x166   : > { %1233 = vmatmul.f32.gmra.mxu0 %v2896_v45  ;;  %689 = vmatmul.f32.gmra.mxu1 %v3338_v31  ;;  %v894_v29 = vadd.f32 %v804_v5, %v643_v27  ;;  %v2437_v45 = vld [vmem:[%s3825_s2 + $0x320] sm:$0xff] }
 0x167   : > { %1042 = vmatmul.f32.gmra.mxu3 %v3338_v31  ;;  %854 = vmatmul.f32.gmra.mxu2 %v749_v37  ;;  %v2469_v27 = vld [vmem:[%s3825_s2 + $0x420] sm:$0xff] }
 0x168   : > { %1566 = vmatpush.msra.mxu2 %v2437_v45  ;;  %1954 = vmatpush.msra.mxu0 %v2469_v27  ;;  %v751_v5 = vld [vmem:[#allocation2 + $0x1a2] sm:$0xff] }
 0x169   : > { %v428_v45 = vld [vmem:[#allocation2 + $0x1a0] sm:$0xff] }
 0x16a   : > { %v995_v39 = vpop.f32.mrf.mxu3  ;;  %v807_v48 = vpop.f32.mrf.mxu2 }
 0x16b   : > { %v3346_v40 = vpop.f32.mrf.mxu0  ;;  %v3348_v35 = vadd.f32 %v995_v39, %v893_v11  ;;  %v645_v44 = vpop.f32.mrf.mxu1  ;;  %v2421_v11 = vld [vmem:[%s3825_s2 + $0x2a0] sm:$0xff] }
 0x16c   : > { %v646_v47 = vadd.f32 %v645_v44, %v3266_v42  ;;  %1371 = vmatpush.msra.mxu1 %v2421_v11  ;;  %v750_v42 = vld [vmem:[#allocation2 + $0x192] sm:$0xff] }
 0x16e   : > { %1236 = vmatmul.f32.gmra.mxu0 %v2960_v10  ;;  %692 = vmatmul.f32.gmra.mxu1 %v426_v61  ;;  %v895_v2 = vadd.f32 %v807_v48, %v646_v47  ;;  %v2452_v48 = vld [vmem:[%s3825_s2 + $0x398] sm:$0xff] }
 0x16f   : > { %1045 = vmatmul.f32.gmra.mxu3 %v426_v61  ;;  %857 = vmatmul.f32.gmra.mxu2 %v750_v42  ;;  %v2420_v61 = vld [vmem:[%s3825_s2 + $0x298] sm:$0xff] }
 0x170   : > { %1372 = vmatpush.msra.mxu1 %v2420_v61  ;;  %1761 = vmatpush.msra.mxu3 %v2452_v48  ;;  %v1140_v61 = vld [vmem:[#allocation2 + $0x1c1] sm:$0xff] }
 0x172   : > { %v998_v59 = vpop.f32.mrf.mxu3  ;;  %v810_v25 = vpop.f32.mrf.mxu2 }
 0x173   : > { %v3363_v51 = vpop.f32.mrf.mxu0  ;;  %v3365_v52 = vadd.f32 %v998_v59, %v894_v29  ;;  %v648_v10 = vpop.f32.mrf.mxu1 }
 0x174   : > { %v649_v12 = vadd.f32 %v648_v10, %v3284_v55 }
 0x176   : > { %1239 = vmatmul.f32.gmra.mxu0 %v3002_v24  ;;  %695 = vmatmul.f32.gmra.mxu1 %v427_v19  ;;  %v896_v22 = vadd.f32 %v810_v25, %v649_v12  ;;  %v2436_v24 = vld [vmem:[%s3825_s2 + $0x318] sm:$0xff]  ;;  %v429_v12 = vld [vmem:[#allocation2 + $0x1b0] sm:$0xff] }
 0x177   : > { %1048 = vmatmul.f32.gmra.mxu3 %v427_v19  ;;  %860 = vmatmul.f32.gmra.mxu2 %v751_v5  ;;  %v2468_v25 = vld [vmem:[%s3825_s2 + $0x418] sm:$0xff]  ;;  %v3401_v19 = vadd.f32 %v3346_v40, %v3348_v35  ;;  %v2435_v5 = vld [vmem:[%s3825_s2 + $0x310] sm:$0xff]  ;;  %v946_v40 = vld [vmem:[#allocation2 + $0x1c0] sm:$0xff] }
 0x178   : > { %1567 = vmatpush.msra.mxu2 %v2436_v24  ;;  %1955 = vmatpush.msra.mxu0 %v2468_v25  ;;  %v2451_v35 = vld [vmem:[%s3825_s2 + $0x390] sm:$0xff]  ;;  %v3420_v24 = vadd.f32 %v3363_v51, %v3365_v52  ;;  %v755_v52 = vld [vmem:[#allocation2 + $0x202] sm:$0xff] }
 0x179   : > { %1762 = vmatpush.msra.mxu3 %v2451_v35  ;;  %v2434_v25 = vld [vmem:[%s3825_s2 + $0x308] sm:$0xff] }
 0x17a   : > { %v1001_v32 = vpop.f32.mrf.mxu3  ;;  %v813_v44 = vpop.f32.mrf.mxu2  ;;  %1568 = vmatpush.msra.mxu2 %v2435_v5 }
 0x17b   : > { %v3372_v29 = vpop.f32.mrf.mxu0  ;;  %v3374_v37 = vadd.f32 %v1001_v32, %v895_v2  ;;  %v651_v55 = vpop.f32.mrf.mxu1  ;;  %v3388_v2 = vadd.f32 %v3335_v20, %v1086_v4  ;;  %v753_v4 = vld [vmem:[#allocation2 + $0x1e2] sm:$0xff] }
 0x17c   : > { %v652_v39 = vadd.f32 %v651_v55, %v3296_v7  ;;  %v752_v7 = vld [vmem:[#allocation2 + $0x1b2] sm:$0xff]  ;;  %1569 = vmatpush.msra.mxu2 %v2434_v25 }
 0x17d   : > { %v2419_v55 = vld [vmem:[%s3825_s2 + $0x290] sm:$0xff] }
 0x17e   : > { %1242 = vmatmul.f32.gmra.mxu0 %v3038_v38  ;;  %698 = vmatmul.f32.gmra.mxu1 %v428_v45  ;;  %v897_v47 = vadd.f32 %v813_v44, %v652_v39  ;;  %v754_v39 = vld [vmem:[#allocation2 + $0x1f2] sm:$0xff] }
 0x17f   : > { %1051 = vmatmul.f32.gmra.mxu3 %v428_v45  ;;  %863 = vmatmul.f32.gmra.mxu2 %v752_v7  ;;  %v431_v7 = vld [vmem:[#allocation2 + $0x1f0] sm:$0xff] }
 0x180   : > { %1373 = vmatpush.msra.mxu1 %v2419_v55 }
 0x182   : > { %v1004_v62 = vpop.f32.mrf.mxu3  ;;  %v816_v10 = vpop.f32.mrf.mxu2 }
 0x183   : > { %v3390_v38 = vpop.f32.mrf.mxu0  ;;  %v3392_v11 = vadd.f32 %v1004_v62, %v896_v22  ;;  %v654_v42 = vpop.f32.mrf.mxu1  ;;  %v2467_v62 = vld [vmem:[%s3825_s2 + $0x410] sm:$0xff] }
 0x184   : > { %v655_v59 = vadd.f32 %v654_v42, %v3314_v28  ;;  %1956 = vmatpush.msra.mxu0 %v2467_v62  ;;  %v3432_v42 = vadd.f32 %v3372_v29, %v3374_v37  ;;  %v2450_v29 = vld [vmem:[%s3825_s2 + $0x388] sm:$0xff] }
 0x185   : > { %v2418_v37 = vld [vmem:[%s3825_s2 + $0x288] sm:$0xff]  ;;  %1763 = vmatpush.msra.mxu3 %v2450_v29  ;;  %v3450_v35 = vadd.f32 %v3390_v38, %v3392_v11  ;;  %v758_v29 = vld [vmem:[#allocation2 + $0x232] sm:$0xff] }
 0x186   : > { %1245 = vmatmul.f32.gmra.mxu0 %v3077_v53  ;;  %701 = vmatmul.f32.gmra.mxu1 %v429_v12  ;;  %v898_v20 = vadd.f32 %v816_v10, %v655_v59  ;;  %v1142_v62 = vld [vmem:[#allocation2 + $0x201] sm:$0xff] }
 0x187   : > { %1054 = vmatmul.f32.gmra.mxu3 %v429_v12  ;;  %866 = vmatmul.f32.gmra.mxu2 %v753_v4  ;;  %v757_v38 = vld [vmem:[#allocation2 + $0x222] sm:$0xff] }
 0x188   : > { %1374 = vmatpush.msra.mxu1 %v2418_v37 }
 0x18a   : > { %v1007_v22 = vpop.f32.mrf.mxu3  ;;  %v819_v32 = vpop.f32.mrf.mxu2 }
 0x18b   : > { %v3403_v28 = vpop.f32.mrf.mxu0  ;;  %v3405_v27 = vadd.f32 %v1007_v22, %v897_v47  ;;  %v657_v53 = vpop.f32.mrf.mxu1  ;;  %v1141_v22 = vld [vmem:[#allocation2 + $0x1f1] sm:$0xff] }
 0x18c   : > { %v658_v51 = vadd.f32 %v657_v53, %v3182_v49  ;;  %v432_v53 = vld [vmem:[#allocation2 + $0x200] sm:$0xff] }
 0x18e   : > { %1248 = vmatmul.f32.gmra.mxu0 %v3101_v63  ;;  %704 = vmatmul.f32.gmra.mxu1 %v3303_v13  ;;  %v899_v59 = vadd.f32 %v819_v32, %v658_v51  ;;  %v756_v32 = vld [vmem:[#allocation2 + $0x212] sm:$0xff] }
 0x18f   : > { %1057 = vmatmul.f32.gmra.mxu3 %v946_v40  ;;  %869 = vmatmul.f32.gmra.mxu2 %v754_v39  ;;  %v433_v51 = vld [vmem:[#allocation2 + $0x210] sm:$0xff] }
 0x192   : > { %v1010_v63 = vpop.f32.mrf.mxu3  ;;  %v822_v48 = vpop.f32.mrf.mxu2 }
 0x193   : > { %v3422_v44 = vpop.f32.mrf.mxu0  ;;  %v3424_v45 = vadd.f32 %v1010_v63, %v898_v20  ;;  %v660_v47 = vpop.f32.mrf.mxu1 }
 0x194   : > { %v661_v5 = vadd.f32 %v660_v47, %v3197_v58  ;;  %v2466_v58 = vld [vmem:[%s3825_s2 + $0x408] sm:$0xff] }
 0x195   : > { %1957 = vmatpush.msra.mxu0 %v2466_v58  ;;  %v1144_v58 = vld [vmem:[#allocation2 + $0x221] sm:$0xff] }
 0x196   : > { %1251 = vmatmul.f32.gmra.mxu0 %v1140_v61  ;;  %707 = vmatmul.f32.gmra.mxu1 %v431_v7  ;;  %v900_v40 = vadd.f32 %v822_v48, %v661_v5 }
 0x197   : > { %1060 = vmatmul.f32.gmra.mxu3 %v431_v7  ;;  %872 = vmatmul.f32.gmra.mxu2 %v755_v52  ;;  %v3462_v52 = vadd.f32 %v3403_v28, %v3405_v27  ;;  %v2449_v28 = vld [vmem:[%s3825_s2 + $0x380] sm:$0xff] }
 0x198   : > { %v2417_v27 = vld [vmem:[%s3825_s2 + $0x280] sm:$0xff]  ;;  %1764 = vmatpush.msra.mxu3 %v2449_v28 }
 0x199   : > { %1375 = vmatpush.msra.mxu1 %v2417_v27  ;;  %v436_v28 = vld [vmem:[#allocation2 + $0x240] sm:$0xff] }
 0x19a   : > { %v1013_v10 = vpop.f32.mrf.mxu3  ;;  %v825_v49 = vpop.f32.mrf.mxu2 }
 0x19b   : > { %v3434_v12 = vpop.f32.mrf.mxu0  ;;  %v3436_v20 = vadd.f32 %v1013_v10, %v899_v59  ;;  %v663_v4 = vpop.f32.mrf.mxu1 }
 0x19c   : > { %v664_v47 = vadd.f32 %v663_v4, %v3208_v6  ;;  %v1143_v4 = vld [vmem:[#allocation2 + $0x211] sm:$0xff] }
 0x19e   : > { %1254 = vmatmul.f32.gmra.mxu0 %v1141_v22  ;;  %710 = vmatmul.f32.gmra.mxu1 %v432_v53  ;;  %v901_v11 = vadd.f32 %v825_v49, %v664_v47  ;;  %v2433_v22 = vld [vmem:[%s3825_s2 + $0x300] sm:$0xff]  ;;  %v435_v47 = vld [vmem:[#allocation2 + $0x230] sm:$0xff] }
 0x19f   : > { %1063 = vmatmul.f32.gmra.mxu3 %v432_v53  ;;  %875 = vmatmul.f32.gmra.mxu2 %v756_v32  ;;  %v434_v53 = vld [vmem:[#allocation2 + $0x220] sm:$0xff] }
 0x1a0   : > { %1570 = vmatpush.msra.mxu2 %v2433_v22 }
 0x1a2   : > { %v1016_v55 = vpop.f32.mrf.mxu3  ;;  %v828_v7 = vpop.f32.mrf.mxu2 }
 0x1a3   : > { %v3452_v39 = vpop.f32.mrf.mxu0  ;;  %v3454_v63 = vadd.f32 %v1016_v55, %v900_v40  ;;  %v666_v61 = vpop.f32.mrf.mxu1 }
 0x1a4   : > { %v667_v49 = vadd.f32 %v666_v61, %v3226_v16  ;;  %v2465_v16 = vld [vmem:[%s3825_s2 + $0x400] sm:$0xff] }
 0x1a5   : > { %1958 = vmatpush.msra.mxu0 %v2465_v16 }
 0x1a6   : > { %1257 = vmatmul.f32.gmra.mxu0 %v1142_v62  ;;  %713 = vmatmul.f32.gmra.mxu1 %v433_v51  ;;  %v902_v37 = vadd.f32 %v828_v7, %v667_v49  ;;  %v3484_v62 = vadd.f32 %v3422_v44, %v3424_v45  ;;  %v759_v7 = vld [vmem:[#allocation2 + $0x242] sm:$0xff] }
 0x1a7   : > { %1066 = vmatmul.f32.gmra.mxu3 %v433_v51  ;;  %878 = vmatmul.f32.gmra.mxu2 %v757_v38 }
 0x1aa   : > { %v1019_v48 = vpop.f32.mrf.mxu3  ;;  %v831_v6 = vpop.f32.mrf.mxu2 }
 0x1ab   : > { %v3464_v59 = vpop.f32.mrf.mxu0  ;;  %v3466_v10 = vadd.f32 %v1019_v48, %v901_v11  ;;  %v669_v25 = vpop.f32.mrf.mxu1 }
 0x1ac   : > { %v670_v61 = vadd.f32 %v669_v25, %v3238_v17  ;;  %v760_v25 = vld [vmem:[#allocation2 + $0x252] sm:$0xff] }
 0x1ae   : > { %1260 = vmatmul.f32.gmra.mxu0 %v1143_v4  ;;  %716 = vmatmul.f32.gmra.mxu1 %v434_v53  ;;  %v903_v38 = vadd.f32 %v831_v6, %v670_v61  ;;  %v3496_v4 = vadd.f32 %v3434_v12, %v3436_v20  ;;  %v3505_v12 = vadd.f32 %v3452_v39, %v3454_v63  ;;  %v1146_v20 = vld [vmem:[#allocation2 + $0x241] sm:$0xff]  ;;  %v1147_v63 = vld [vmem:[#allocation2 + $0x251] sm:$0xff] }
 0x1af   : > { %1069 = vmatmul.f32.gmra.mxu3 %v434_v53  ;;  %881 = vmatmul.f32.gmra.mxu2 %v758_v29  ;;  %v1145_v53 = vld [vmem:[#allocation2 + $0x231] sm:$0xff]  ;;  %v3515_v39 = vadd.f32 %v3464_v59, %v3466_v10  ;;  %v1148_v10 = vld [vmem:[#allocation2 + $0x261] sm:$0xff] }
 0x1b2   : > { %v1022_v5 = vpop.f32.mrf.mxu3  ;;  %v834_v51 = vpop.f32.mrf.mxu2 }
 0x1b3   : > { %v3478_v32 = vpop.f32.mrf.mxu0  ;;  %v3480_v40 = vadd.f32 %v1022_v5, %v902_v37  ;;  %v672_v55 = vpop.f32.mrf.mxu1 }
 0x1b4   : > { %v673_v17 = vadd.f32 %v672_v55, %v3256_v36 }
 0x1b5   : > { %v3525_v59 = vadd.f32 %v3478_v32, %v3480_v40  ;;  %v1313_v40 = vld [vmem:[#allocation2 + $0x32] sm:$0xff] }
 0x1b6   : > { %1263 = vmatmul.f32.gmra.mxu0 %v1144_v58  ;;  %719 = vmatmul.f32.gmra.mxu1 %v435_v47  ;;  %v904_v6 = vadd.f32 %v834_v51, %v673_v17  ;;  %v437_v58 = vld [vmem:[#allocation2 + $0x250] sm:$0xff] }
 0x1b7   : > { %1072 = vmatmul.f32.gmra.mxu3 %v435_v47  ;;  %884 = vmatmul.f32.gmra.mxu2 %v759_v7 }
 0x1ba   : > { %v1025_v11 = vpop.f32.mrf.mxu3  ;;  %v837_v22 = vpop.f32.mrf.mxu2 }
 0x1bb   : > { %v3490_v48 = vpop.f32.mrf.mxu0  ;;  %v3492_v44 = vadd.f32 %v1025_v11, %v903_v38  ;;  %v675_v45 = vpop.f32.mrf.mxu1  ;;  %v1311_v38 = vld [vmem:[#allocation2 + $0x12] sm:$0xff]  ;;  %v954_v11 = vld [vmem:[#allocation2 + $0x260] sm:$0xff] }
 0x1bc   : > { %v676_v36 = vadd.f32 %v675_v45, %v3268_v43 }
 0x1bd   : > { %v3534_v32 = vadd.f32 %v3490_v48, %v3492_v44  ;;  %v1314_v44 = vld [vmem:[#allocation2 + $0x42] sm:$0xff] }
 0x1be   : > { %1266 = vmatmul.f32.gmra.mxu0 %v1145_v53  ;;  %722 = vmatmul.f32.gmra.mxu1 %v436_v28  ;;  %v905_v55 = vadd.f32 %v837_v22, %v676_v36 }
 0x1bf   : > { %1075 = vmatmul.f32.gmra.mxu3 %v436_v28  ;;  %887 = vmatmul.f32.gmra.mxu2 %v760_v25  ;;  %v1312_v25 = vld [vmem:[#allocation2 + $0x22] sm:$0xff] }
 0x1c2   : > { %v1028_v27 = vpop.f32.mrf.mxu3  ;;  %v840_v5 = vpop.f32.mrf.mxu2 }
 0x1c3   : > { %v3499_v49 = vpop.f32.mrf.mxu0  ;;  %v3501_v29 = vadd.f32 %v1028_v27, %v904_v6  ;;  %v678_v37 = vpop.f32.mrf.mxu1 }
 0x1c4   : > { %v679_v43 = vadd.f32 %v678_v37, %v3286_v56  ;;  %v1700_v56 = vld [vmem:[#allocation2 + $0x21] sm:$0xff] }
 0x1c5   : > { %v3541_v48 = vadd.f32 %v3499_v49, %v3501_v29  ;;  %v1315_v29 = vld [vmem:[#allocation2 + $0x52] sm:$0xff] }
 0x1c6   : > { %1269 = vmatmul.f32.gmra.mxu0 %v1146_v20  ;;  %725 = vmatmul.f32.gmra.mxu1 %v437_v58 }
 0x1c7   : > { %1078 = vmatmul.f32.gmra.mxu3 %v437_v58  ;;  %1571 = vmatmul.f32.vlgmr.msra.gmra.mxu2 %v3135_v21  ;;  %v906_v21 = vadd.f32 %v840_v5, %v679_v43 }
 0x1ca   : > { %v1031_v51 = vpop.f32.mrf.mxu3  ;;  %v843_v7 = vpop.f32.mrf.mxu2 }
 0x1cb   : > { %v3509_v47 = vpop.f32.mrf.mxu0  ;;  %v3511_v16 = vadd.f32 %v1031_v51, %v905_v55  ;;  %v681_v61 = vpop.f32.mrf.mxu1  ;;  %v1701_v55 = vld [vmem:[#allocation2 + $0x31] sm:$0xff] }
 0x1cc   : > { %v682_v6 = vadd.f32 %v681_v61, %v3184_v50  ;;  %v1509_v51 = vld [vmem:[#allocation2 + $0x50] sm:$0xff] }
 0x1cd   : > { %v3550_v49 = vadd.f32 %v3509_v47, %v3511_v16  ;;  %v1316_v16 = vld [vmem:[#allocation2 + $0x62] sm:$0xff] }
 0x1ce   : > { %1272 = vmatmul.f32.gmra.mxu0 %v1147_v63  ;;  %1376 = vmatmul.f32.vlgmr.msra.gmra.mxu1 %v1311_v38  ;;  %v907_v27 = vadd.f32 %v843_v7, %v682_v6 }
 0x1cf   : > { %1081 = vmatmul.f32.gmra.mxu3 %v954_v11  ;;  %1574 = vmatmul.f32.gmra.mxu2 %v3146_v26  ;;  %v1508_v26 = vld [vmem:[#allocation2 + $0x40] sm:$0xff] }
 0x1d2   : > { %v1034_v45 = vpop.f32.mrf.mxu3  ;;  %v846_v17 = vpop.f32.mrf.mxu2 }
 0x1d3   : > { %v3519_v22 = vpop.f32.mrf.mxu0  ;;  %v3521_v53 = vadd.f32 %v1034_v45, %v906_v21  ;;  %v684_v28 = vpop.f32.mrf.mxu1  ;;  %v1702_v21 = vld [vmem:[#allocation2 + $0x41] sm:$0xff] }
 0x1d4   : > { %v685_v50 = vadd.f32 %v684_v28, %v3199_v60  ;;  %v1510_v45 = vld [vmem:[#allocation2 + $0x60] sm:$0xff] }
 0x1d5   : > { %v3559_v47 = vadd.f32 %v3519_v22, %v3521_v53  ;;  %v1317_v53 = vld [vmem:[#allocation2 + $0x72] sm:$0xff] }
 0x1d6   : > { %1275 = vmatmul.f32.gmra.mxu0 %v1148_v10  ;;  %1379 = vmatmul.f32.gmra.mxu1 %v1312_v25  ;;  %v908_v61 = vadd.f32 %v846_v17, %v685_v50 }
 0x1d7   : > { %1765 = vmatmul.f32.vlgmr.msra.gmra.mxu3 %v1700_v56  ;;  %1577 = vmatmul.f32.gmra.mxu2 %v1508_v26  ;;  %v1703_v26 = vld [vmem:[#allocation2 + $0x51] sm:$0xff] }
 0x1da   : > { %v1037_v37 = vpop.f32.mrf.mxu3  ;;  %v849_v36 = vpop.f32.mrf.mxu2 }
 0x1db   : > { %v3528_v5 = vpop.f32.mrf.mxu0  ;;  %v3530_v20 = vadd.f32 %v1037_v37, %v907_v27  ;;  %v687_v58 = vpop.f32.mrf.mxu1  ;;  %v1511_v27 = vld [vmem:[#allocation2 + $0x70] sm:$0xff] }
 0x1dc   : > { %v688_v60 = vadd.f32 %v687_v58, %v3213_v8 }
 0x1dd   : > { %v3568_v22 = vadd.f32 %v3528_v5, %v3530_v20  ;;  %v1318_v20 = vld [vmem:[#allocation2 + $0x82] sm:$0xff] }
 0x1de   : > { %1959 = vmatmul.f32.vlgmr.msra.gmra.mxu0 %v1312_v25  ;;  %1382 = vmatmul.f32.gmra.mxu1 %v1313_v40  ;;  %v909_v28 = vadd.f32 %v849_v36, %v688_v60 }
 0x1df   : > { %1768 = vmatmul.f32.gmra.mxu3 %v1701_v55  ;;  %1580 = vmatmul.f32.gmra.mxu2 %v1509_v51  ;;  %v1704_v51 = vld [vmem:[#allocation2 + $0x61] sm:$0xff] }
 0x1e2   : > { %v1040_v7 = vpop.f32.mrf.mxu3  ;;  %v852_v43 = vpop.f32.mrf.mxu2 }
 0x1e3   : > { %v3537_v63 = vpop.f32.mrf.mxu0  ;;  %v1102_v38 = vadd.f32 %v1040_v7, %v908_v61  ;;  %v690_v11 = vpop.f32.mrf.mxu1  ;;  %v1512_v61 = vld [vmem:[#allocation2 + $0x80] sm:$0xff] }
 0x1e4   : > { %v691_v8 = vadd.f32 %v690_v11, %v3228_v33 }
 0x1e5   : > { %v3577_v5 = vadd.f32 %v3537_v63, %v1102_v38  ;;  %v1319_v38 = vld [vmem:[#allocation2 + $0xb2] sm:$0xff] }
 0x1e6   : > { %1962 = vmatmul.f32.gmra.mxu0 %v1313_v40  ;;  %1385 = vmatmul.f32.gmra.mxu1 %v1314_v44  ;;  %v910_v37 = vadd.f32 %v852_v43, %v691_v8  ;;  %v1706_v8 = vld [vmem:[#allocation2 + $0x81] sm:$0xff] }
 0x1e7   : > { %1771 = vmatmul.f32.gmra.mxu3 %v1702_v21  ;;  %1583 = vmatmul.f32.gmra.mxu2 %v1510_v45  ;;  %v1705_v45 = vld [vmem:[#allocation2 + $0x71] sm:$0xff] }
 0x1ea   : > { %v1043_v17 = vpop.f32.mrf.mxu3  ;;  %v855_v6 = vpop.f32.mrf.mxu2 }
 0x1eb   : > { %v3544_v10 = vpop.f32.mrf.mxu0  ;;  %v3546_v25 = vadd.f32 %v1043_v17, %v909_v28  ;;  %v693_v56 = vpop.f32.mrf.mxu1 }
 0x1ec   : > { %v694_v33 = vadd.f32 %v693_v56, %v3243_v57 }
 0x1ed   : > { %v3586_v63 = vadd.f32 %v3544_v10, %v3546_v25  ;;  %v1320_v25 = vld [vmem:[#allocation2 + $0xc2] sm:$0xff] }
 0x1ee   : > { %1965 = vmatmul.f32.gmra.mxu0 %v1314_v44  ;;  %1388 = vmatmul.f32.gmra.mxu1 %v1315_v29  ;;  %v911_v7 = vadd.f32 %v855_v6, %v694_v33 }
 0x1ef   : > { %1774 = vmatmul.f32.gmra.mxu3 %v1703_v26  ;;  %1586 = vmatmul.f32.gmra.mxu2 %v1511_v27  ;;  %v1514_v27 = vld [vmem:[#allocation2 + $0xc0] sm:$0xff] }
 0x1f2   : > { %v1046_v58 = vpop.f32.mrf.mxu3  ;;  %v858_v50 = vpop.f32.mrf.mxu2 }
 0x1f3   : > { %v3553_v36 = vpop.f32.mrf.mxu0  ;;  %v3555_v40 = vadd.f32 %v1046_v58, %v910_v37  ;;  %v696_v55 = vpop.f32.mrf.mxu1 }
 0x1f4   : > { %v697_v57 = vadd.f32 %v696_v55, %v3258_v18 }
 0x1f5   : > { %v3595_v10 = vadd.f32 %v3553_v36, %v3555_v40  ;;  %v1321_v40 = vld [vmem:[#allocation2 + $0xd2] sm:$0xff] }
 0x1f6   : > { %1968 = vmatmul.f32.gmra.mxu0 %v1315_v29  ;;  %1391 = vmatmul.f32.gmra.mxu1 %v1316_v16  ;;  %v912_v28 = vadd.f32 %v858_v50, %v697_v57 }
 0x1f7   : > { %1777 = vmatmul.f32.gmra.mxu3 %v1704_v51  ;;  %1589 = vmatmul.f32.gmra.mxu2 %v1512_v61  ;;  %v1707_v51 = vld [vmem:[#allocation2 + $0x91] sm:$0xff] }
 0x1f8   : > { %v1515_v61 = vld [vmem:[#allocation2 + $0xd0] sm:$0xff] }
 0x1fa   : > { %v1049_v11 = vpop.f32.mrf.mxu3  ;;  %v861_v60 = vpop.f32.mrf.mxu2 }
 0x1fb   : > { %v3562_v43 = vpop.f32.mrf.mxu0  ;;  %v3564_v44 = vadd.f32 %v1049_v11, %v911_v7  ;;  %v699_v21 = vpop.f32.mrf.mxu1 }
 0x1fc   : > { %v700_v18 = vadd.f32 %v699_v21, %v3273_v30 }
 0x1fd   : > { %v3604_v36 = vadd.f32 %v3562_v43, %v3564_v44  ;;  %v1322_v44 = vld [vmem:[#allocation2 + $0xe2] sm:$0xff] }
 0x1fe   : > { %1971 = vmatmul.f32.gmra.mxu0 %v1316_v16  ;;  %1394 = vmatmul.f32.gmra.mxu1 %v1317_v53  ;;  %v913_v37 = vadd.f32 %v861_v60, %v700_v18  ;;  %v1901_v60 = vld [vmem:[#allocation2 + $0x92] sm:$0xff] }
 0x1ff   : > { %1780 = vmatmul.f32.gmra.mxu3 %v1705_v45  ;;  %1592 = vmatmul.f32.gmra.mxu2 %v3303_v13 }
 0x202   : > { %v1052_v17 = vpop.f32.mrf.mxu3  ;;  %v864_v26 = vpop.f32.mrf.mxu2 }
 0x203   : > { %v3572_v56 = vpop.f32.mrf.mxu0  ;;  %v3574_v6 = vadd.f32 %v1052_v17, %v912_v28  ;;  %v702_v29 = vpop.f32.mrf.mxu1  ;;  %v1516_v17 = vld [vmem:[#allocation2 + $0xe0] sm:$0xff] }
 0x204   : > { %v703_v30 = vadd.f32 %v702_v29, %v3288_v46  ;;  %v1708_v46 = vld [vmem:[#allocation2 + $0xc1] sm:$0xff] }
 0x205   : > { %v3611_v43 = vadd.f32 %v3572_v56, %v3574_v6  ;;  %v1323_v6 = vld [vmem:[#allocation2 + $0xf2] sm:$0xff] }
 0x206   : > { %1974 = vmatmul.f32.gmra.mxu0 %v1317_v53  ;;  %1397 = vmatmul.f32.gmra.mxu1 %v1318_v20  ;;  %v914_v7 = vadd.f32 %v864_v26, %v703_v30 }
 0x207   : > { %1783 = vmatmul.f32.gmra.mxu3 %v1706_v8  ;;  %1595 = vmatmul.f32.gmra.mxu2 %v1514_v27 }
 0x20a   : > { %v1055_v58 = vpop.f32.mrf.mxu3  ;;  %v867_v33 = vpop.f32.mrf.mxu2 }
 0x20b   : > { %v3580_v55 = vpop.f32.mrf.mxu0  ;;  %v3582_v50 = vadd.f32 %v1055_v58, %v913_v37  ;;  %v705_v16 = vpop.f32.mrf.mxu1  ;;  %v1709_v37 = vld [vmem:[#allocation2 + $0xd1] sm:$0xff] }
 0x20c   : > { %v706_v28 = vadd.f32 %v705_v16, %v3204_v0  ;;  %v1517_v58 = vld [vmem:[#allocation2 + $0xf0] sm:$0xff] }
 0x20d   : > { %v3618_v56 = vadd.f32 %v3580_v55, %v3582_v50  ;;  %v1324_v55 = vld [vmem:[#allocation2 + $0x102] sm:$0xff] }
 0x20e   : > { %1977 = vmatmul.f32.gmra.mxu0 %v1318_v20  ;;  %1400 = vmatmul.f32.gmra.mxu1 %v1319_v38  ;;  %v915_v29 = vadd.f32 %v867_v33, %v706_v28  ;;  %v1712_v50 = vld [vmem:[#allocation2 + $0x101] sm:$0xff] }
 0x20f   : > { %1786 = vmatmul.f32.gmra.mxu3 %v1707_v51  ;;  %1598 = vmatmul.f32.gmra.mxu2 %v1515_v61 }
 0x212   : > { %v1058_v11 = vpop.f32.mrf.mxu3  ;;  %v870_v57 = vpop.f32.mrf.mxu2 }
 0x213   : > { %v3589_v21 = vpop.f32.mrf.mxu0  ;;  %v3591_v53 = vadd.f32 %v1058_v11, %v914_v7  ;;  %v708_v45 = vpop.f32.mrf.mxu1  ;;  %v1710_v7 = vld [vmem:[#allocation2 + $0xe1] sm:$0xff] }
 0x214   : > { %v709_v0 = vadd.f32 %v708_v45, %v3222_v14  ;;  %v1518_v11 = vld [vmem:[#allocation2 + $0x100] sm:$0xff] }
 0x216   : > { %1980 = vmatmul.f32.gmra.mxu0 %v1901_v60  ;;  %1403 = vmatmul.f32.gmra.mxu1 %v1320_v25  ;;  %v916_v16 = vadd.f32 %v870_v57, %v709_v0 }
 0x217   : > { %1789 = vmatmul.f32.gmra.mxu3 %v1708_v46  ;;  %1601 = vmatmul.f32.gmra.mxu2 %v1516_v17  ;;  %v1711_v17 = vld [vmem:[#allocation2 + $0xf1] sm:$0xff] }
 0x21a   : > { %v1061_v26 = vpop.f32.mrf.mxu3  ;;  %v873_v27 = vpop.f32.mrf.mxu2 }
 0x21b   : > { %v3598_v20 = vpop.f32.mrf.mxu0  ;;  %v3600_v8 = vadd.f32 %v1061_v26, %v915_v29  ;;  %v711_v18 = vpop.f32.mrf.mxu1  ;;  %v1519_v29 = vld [vmem:[#allocation2 + $0x110] sm:$0xff] }
 0x21c   : > { %v712_v14 = vadd.f32 %v711_v18, %v3234_v23 }
 0x21e   : > { %1983 = vmatmul.f32.gmra.mxu0 %v1320_v25  ;;  %1406 = vmatmul.f32.gmra.mxu1 %v1321_v40  ;;  %v917_v60 = vadd.f32 %v873_v27, %v712_v14 }
 0x21f   : > { %1792 = vmatmul.f32.gmra.mxu3 %v1709_v37  ;;  %1604 = vmatmul.f32.gmra.mxu2 %v1517_v58  ;;  %v3623_v58 = vadd.f32 %v3589_v21, %v3591_v53  ;;  %v3632_v21 = vadd.f32 %v3598_v20, %v3600_v8  ;;  %v1325_v53 = vld [vmem:[#allocation2 + $0x112] sm:$0xff]  ;;  %v1326_v8 = vld [vmem:[#allocation2 + $0x122] sm:$0xff] }
 0x222   : > { %v1064_v51 = vpop.f32.mrf.mxu3  ;;  %v876_v61 = vpop.f32.mrf.mxu2 }
 0x223   : > { %v3607_v33 = vpop.f32.mrf.mxu0  ;;  %v1110_v38 = vadd.f32 %v1064_v51, %v916_v16  ;;  %v714_v30 = vpop.f32.mrf.mxu1 }
 0x224   : > { %v715_v23 = vadd.f32 %v714_v30, %v3252_v34  ;;  %v1520_v34 = vld [vmem:[#allocation2 + $0x120] sm:$0xff] }
 0x225   : > { %v3641_v20 = vadd.f32 %v3607_v33, %v1110_v38  ;;  %v1327_v38 = vld [vmem:[#allocation2 + $0x152] sm:$0xff] }
 0x226   : > { %1986 = vmatmul.f32.gmra.mxu0 %v1321_v40  ;;  %1409 = vmatmul.f32.gmra.mxu1 %v1322_v44  ;;  %v918_v26 = vadd.f32 %v876_v61, %v715_v23  ;;  %v1714_v23 = vld [vmem:[#allocation2 + $0x121] sm:$0xff] }
 0x227   : > { %1795 = vmatmul.f32.gmra.mxu3 %v1710_v7  ;;  %1607 = vmatmul.f32.gmra.mxu2 %v1518_v11  ;;  %v1713_v11 = vld [vmem:[#allocation2 + $0x111] sm:$0xff] }
 0x22a   : > { %v1067_v45 = vpop.f32.mrf.mxu3  ;;  %v879_v28 = vpop.f32.mrf.mxu2 }
 0x22b   : > { %v3614_v57 = vpop.f32.mrf.mxu0  ;;  %v1111_v25 = vadd.f32 %v1067_v45, %v917_v60  ;;  %v717_v46 = vpop.f32.mrf.mxu1 }
 0x22c   : > { %v718_v16 = vadd.f32 %v717_v46, %v3264_v41 }
 0x22d   : > { %v3650_v33 = vadd.f32 %v3614_v57, %v1111_v25  ;;  %v1328_v25 = vld [vmem:[#allocation2 + $0x162] sm:$0xff] }
 0x22e   : > { %1989 = vmatmul.f32.gmra.mxu0 %v1322_v44  ;;  %1412 = vmatmul.f32.gmra.mxu1 %v1323_v6  ;;  %v919_v51 = vadd.f32 %v879_v28, %v718_v16 }
 0x22f   : > { %1798 = vmatmul.f32.gmra.mxu3 %v1711_v17  ;;  %1610 = vmatmul.f32.gmra.mxu2 %v1519_v29 }
 0x232   : > { %v1070_v18 = vpop.f32.mrf.mxu3  ;;  %v882_v0 = vpop.f32.mrf.mxu2 }
 0x233   : > { %v1264_v27 = vpop.f32.mrf.mxu0  ;;  %v1112_v40 = vadd.f32 %v1070_v18, %v918_v26  ;;  %v720_v37 = vpop.f32.mrf.mxu1 }
 0x234   : > { %v721_v41 = vadd.f32 %v720_v37, %v3282_v54 }
 0x235   : > { %v3658_v57 = vadd.f32 %v1264_v27, %v1112_v40  ;;  %v3666_v27 = vld [vmem:[%s3826_s3] ss:$0 sm:$0xff] }
 0x236   : > { %1992 = vmatmul.f32.gmra.mxu0 %v1323_v6  ;;  %1415 = vmatmul.f32.gmra.mxu1 %v1324_v55  ;;  %v920_v60 = vadd.f32 %v882_v0, %v721_v41  ;;  %v1715_v0 = vld [vmem:[#allocation2 + $0x131] sm:$0xff] }
 0x237   : > { %1801 = vmatmul.f32.gmra.mxu3 %v1712_v50  ;;  %1613 = vmatmul.f32.gmra.mxu2 %v1520_v34  ;;  %v1909_v34 = vld [vmem:[#allocation2 + $0x132] sm:$0xff] }
 0x23a   : > { %v1073_v30 = vpop.f32.mrf.mxu3  ;;  %v885_v14 = vpop.f32.mrf.mxu2 }
 0x23b   : > { %v3626_v61 = vpop.f32.mrf.mxu0  ;;  %v3628_v44 = vadd.f32 %v1073_v30, %v919_v51  ;;  %v723_v7 = vpop.f32.mrf.mxu1 }
 0x23c   : > { %v724_v54 = vadd.f32 %v723_v7, %v3294_v3 }
 0x23e   : > { %1995 = vmatmul.f32.gmra.mxu0 %v1324_v55  ;;  %1418 = vmatmul.f32.gmra.mxu1 %v1325_v53  ;;  %v921_v29 = vadd.f32 %v885_v14, %v724_v54 }
 0x23f   : > { %1804 = vmatmul.f32.gmra.mxu3 %v1713_v11  ;;  %1616 = vmatmul.f32.gmra.mxu2 %v3303_v13 }
 0x242   : > { %v1076_v45 = vpop.f32.mrf.mxu3  ;;  %v888_v17 = vpop.f32.mrf.mxu2 }
 0x243   : > { %v3636_v46 = vpop.f32.mrf.mxu0  ;;  %v3638_v28 = vadd.f32 %v1076_v45, %v920_v60  ;;  %v726_v6 = vpop.f32.mrf.mxu1 }
 0x244   : > { %v727_v3 = vadd.f32 %v726_v6, %v3312_v1  ;;  %v1716_v1 = vld [vmem:[#allocation2 + $0x161] sm:$0xff]  ;;  %v3670_v6 = vadd.f32 %v3626_v61, %v3628_v44 }
 0x246   : > { %1998 = vmatmul.f32.gmra.mxu0 %v1325_v53  ;;  %1421 = vmatmul.f32.gmra.mxu1 %v1326_v8  ;;  %v922_v50 = vadd.f32 %v888_v17, %v727_v3  ;;  %v1329_v17 = vld [vmem:[#allocation2 + $0x172] sm:$0xff]  ;;  %v3681_v3 = vadd.f32 %v3636_v46, %v3638_v28 }
 0x247   : > { %1807 = vmatmul.f32.gmra.mxu3 %v1714_v23  ;;  %1619 = vmatmul.f32.gmra.mxu2 %v3324_v9 }
 0x24a   : > { %v1079_v13 = vpop.f32.mrf.mxu3  ;;  %v1572_v55 = vpop.f32.mrf.mxu2 }
 0x24b   : > { %v3645_v26 = vpop.f32.mrf.mxu0  ;;  %v3647_v18 = vadd.f32 %v1079_v13, %v921_v29  ;;  %v1377_v37 = vpop.f32.mrf.mxu1  ;;  %v1525_v29 = vld [vmem:[#allocation2 + $0x190] sm:$0xff] }
 0x24c   : > { %v1473_v14 = vadd.f32 %v1377_v37, %v3354_v15 }
 0x24e   : > { %2001 = vmatmul.f32.gmra.mxu0 %v1326_v8  ;;  %1424 = vmatmul.f32.gmra.mxu1 %v1327_v38  ;;  %v1668_v53 = vadd.f32 %v1572_v55, %v1473_v14  ;;  %v1717_v8 = vld [vmem:[#allocation2 + $0x171] sm:$0xff] }
 0x24f   : > { %1810 = vmatmul.f32.gmra.mxu3 %v1715_v0  ;;  %1622 = vmatmul.f32.gmra.mxu2 %v3338_v31  ;;  %v1524_v31 = vld [vmem:[#allocation2 + $0x180] sm:$0xff] }
 0x252   : > { %v1082_v9 = vpop.f32.mrf.mxu3  ;;  %v1575_v7 = vpop.f32.mrf.mxu2 }
 0x253   : > { %v3654_v16 = vpop.f32.mrf.mxu0  ;;  %v3656_v51 = vadd.f32 %v1082_v9, %v922_v50  ;;  %v1380_v30 = vpop.f32.mrf.mxu1 }
 0x254   : > { %v1474_v23 = vadd.f32 %v1380_v30, %v3388_v2  ;;  %v1718_v30 = vld [vmem:[#allocation2 + $0x181] sm:$0xff] }
 0x256   : > { %2004 = vmatmul.f32.gmra.mxu0 %v1909_v34  ;;  %1427 = vmatmul.f32.gmra.mxu1 %v1328_v25  ;;  %v1669_v13 = vadd.f32 %v1575_v7, %v1474_v23  ;;  %v1330_v34 = vld [vmem:[#allocation2 + $0x182] sm:$0xff] }
 0x257   : > { %1813 = vmatmul.f32.gmra.mxu3 %v1716_v1  ;;  %1625 = vmatmul.f32.gmra.mxu2 %v1524_v31  ;;  %v1526_v1 = vld [vmem:[#allocation2 + $0x1a0] sm:$0xff] }
 0x25a   : > { %v1766_v11 = vpop.f32.mrf.mxu3  ;;  %v1578_v45 = vpop.f32.mrf.mxu2 }
 0x25b   : > { %v1960_v41 = vpop.f32.mrf.mxu0  ;;  %v1862_v60 = vadd.f32 %v1766_v11, %v1668_v53  ;;  %v1383_v40 = vpop.f32.mrf.mxu1 }
 0x25c   : > { %v1475_v7 = vadd.f32 %v1383_v40, %v3401_v19 }
 0x25d   : > { %v2056_v15 = vadd.f32 %v1960_v41, %v1862_v60 }
 0x25e   : > { %2007 = vmatmul.f32.gmra.mxu0 %v1328_v25  ;;  %1430 = vmatmul.f32.gmra.mxu1 %v1329_v17  ;;  %v1670_v14 = vadd.f32 %v1578_v45, %v1475_v7  ;;  %v1719_v45 = vld [vmem:[#allocation2 + $0x191] sm:$0xff] }
 0x25f   : > { %v2092_v54 = vadd.f32 %v3666_v27, %v2056_v15  ;;  %1816 = vmatmul.f32.gmra.mxu3 %v1717_v8  ;;  %1628 = vmatmul.f32.gmra.mxu2 %v1525_v29  ;;  %v3689_v15 = vadd.f32 %v3645_v26, %v3647_v18 }
 0x261   : > { %v2124_v37 = vmul.f32 1.4142135, %v2092_v54  ;;  %v1527_v54 = vld [vmem:[#allocation2 + $0x1b0] sm:$0xff] }
 0x262   : > { %v1769_v0 = vpop.f32.mrf.mxu3  ;;  %v1581_v38 = vpop.f32.mrf.mxu2 }
 0x263   : > { %vm2156_vm2 = vcmp.ge.f32.partialorder %v2124_v37, 0.0  ;;  %v2188_v61 = vmul.f32 0.2, %v2124_v37  ;;  %v1963_v44 = vpop.f32.mrf.mxu0  ;;  %v1863_v55 = vadd.f32 %v1769_v0, %v1669_v13  ;;  %v1386_v2 = vpop.f32.mrf.mxu1 }
 0x264   : > { %v1476_v8 = vadd.f32 %v1386_v2, %v3420_v24 }
 0x265   : > { %v2220_v50 = vsel %vm2156_vm2, %v2124_v37, %v2188_v61  ;;  %v2057_v9 = vadd.f32 %v1963_v44, %v1863_v55  ;;  %v3697_v55 = vadd.f32 %v3654_v16, %v3656_v51 }
 0x266   : > { %2252 = vst.msk [vmem:[%s3677_s8] sm:$0xff] %vm339_vm0, %v2220_v50  ;;  %2010 = vmatmul.f32.gmra.mxu0 %v1329_v17  ;;  %1433 = vmatmul.f32.gmra.mxu1 %v1330_v34  ;;  %v1331_v17 = vld [vmem:[#allocation2 + $0x192] sm:$0xff]  ;;  %v1671_v29 = vadd.f32 %v1581_v38, %v1476_v8  ;;  %v1332_v50 = vld [vmem:[#allocation2 + $0x1a2] sm:$0xff] }
 0x267   : > { %v2093_v25 = vadd.f32 %v3666_v27, %v2057_v9  ;;  %1819 = vmatmul.f32.gmra.mxu3 %v1718_v30  ;;  %1631 = vmatmul.f32.gmra.mxu2 %v1526_v1  ;;  %v1720_v38 = vld [vmem:[#allocation2 + $0x1a1] sm:$0xff] }
 0x268   : > { %v1528_v30 = vld [vmem:[#allocation2 + $0x1c0] sm:$0xff] }
 0x269   : > { %v2125_v31 = vmul.f32 1.4142135, %v2093_v25 }
 0x26a   : > { %v1772_v46 = vpop.f32.mrf.mxu3  ;;  %v1584_v60 = vpop.f32.mrf.mxu2 }
 0x26b   : > { %vm2157_vm3 = vcmp.ge.f32.partialorder %v2125_v31, 0.0  ;;  %v2189_v28 = vmul.f32 0.2, %v2125_v31  ;;  %v1966_v53 = vpop.f32.mrf.mxu0  ;;  %v1864_v11 = vadd.f32 %v1772_v46, %v1670_v14  ;;  %v1389_v41 = vpop.f32.mrf.mxu1 }
 0x26c   : > { %v1477_v9 = vadd.f32 %v1389_v41, %v3432_v42  ;;  %v1721_v42 = vld [vmem:[#allocation2 + $0x1b1] sm:$0xff] }
 0x26d   : > { %v2221_v19 = vsel %vm2157_vm3, %v2125_v31, %v2189_v28  ;;  %v2058_v40 = vadd.f32 %v1966_v53, %v1864_v11  ;;  %v1333_v11 = vld [vmem:[#allocation2 + $0x1b2] sm:$0xff] }
 0x26e   : > { %2253 = vst.msk [vmem:[%s3677_s8 + $0x8] sm:$0xff] %vm339_vm0, %v2221_v19  ;;  %2013 = vmatmul.f32.gmra.mxu0 %v1330_v34  ;;  %1436 = vmatmul.f32.gmra.mxu1 %v1331_v17  ;;  %v1672_v7 = vadd.f32 %v1584_v60, %v1477_v9 }
 0x26f   : > { %v2094_v23 = vadd.f32 %v3666_v27, %v2058_v40  ;;  %1822 = vmatmul.f32.gmra.mxu3 %v1719_v45  ;;  %1634 = vmatmul.f32.gmra.mxu2 %v1527_v54 }
 0x271   : > { %v2126_v13 = vmul.f32 1.4142135, %v2094_v23 }
 0x272   : > { %v1775_v26 = vpop.f32.mrf.mxu3  ;;  %v1587_v44 = vpop.f32.mrf.mxu2 }
 0x273   : > { %vm2158_vm4 = vcmp.ge.f32.partialorder %v2126_v13, 0.0  ;;  %v2190_v18 = vmul.f32 0.2, %v2126_v13  ;;  %v1969_v37 = vpop.f32.mrf.mxu0  ;;  %v1865_v0 = vadd.f32 %v1775_v26, %v1671_v29  ;;  %v1392_v61 = vpop.f32.mrf.mxu1 }
 0x274   : > { %v1478_v41 = vadd.f32 %v1392_v61, %v3450_v35  ;;  %v1334_v35 = vld [vmem:[#allocation2 + $0x1c2] sm:$0xff] }
 0x275   : > { %v2222_v24 = vsel %vm2158_vm4, %v2126_v13, %v2190_v18  ;;  %v2059_v2 = vadd.f32 %v1969_v37, %v1865_v0  ;;  %v1722_v37 = vld [vmem:[#allocation2 + $0x1c1] sm:$0xff] }
 0x276   : > { %2254 = vst.msk [vmem:[%s3677_s8 + $0x10] sm:$0xff] %vm339_vm0, %v2222_v24  ;;  %2016 = vmatmul.f32.gmra.mxu0 %v1331_v17  ;;  %1439 = vmatmul.f32.gmra.mxu1 %v1332_v50  ;;  %v1673_v19 = vadd.f32 %v1587_v44, %v1478_v41  ;;  %v3707_v17 = vld [vmem:[#allocation2] sm:$0xff]  ;;  %v1917_v41 = vld [vmem:[#allocation2 + $0x1d2] sm:$0xff] }
 0x277   : > { %v2095_v34 = vadd.f32 %v3666_v27, %v2059_v2  ;;  %1825 = vmatmul.f32.gmra.mxu3 %v1720_v38  ;;  %1637 = vmatmul.f32.gmra.mxu2 %v1528_v30  ;;  %v1530_v44 = vld [vmem:[#allocation2 + $0x200] sm:$0xff] }
 0x279   : > { %v2127_v25 = vmul.f32 1.4142135, %v2095_v34 }
 0x27a   : > { %v1778_v16 = vpop.f32.mrf.mxu3  ;;  %v1590_v46 = vpop.f32.mrf.mxu2 }
 0x27b   : > { %vm2159_vm5 = vcmp.ge.f32.partialorder %v2127_v25, 0.0  ;;  %v2191_v51 = vmul.f32 0.2, %v2127_v25  ;;  %v1972_v1 = vpop.f32.mrf.mxu0  ;;  %v1866_v14 = vadd.f32 %v1778_v16, %v1672_v7  ;;  %v1395_v31 = vpop.f32.mrf.mxu1  ;;  %v1723_v7 = vld [vmem:[#allocation2 + $0x1d1] sm:$0xff] }
 0x27c   : > { %v1479_v0 = vadd.f32 %v1395_v31, %v3462_v52  ;;  %v1531_v31 = vld [vmem:[#allocation2 + $0x210] sm:$0xff] }
 0x27d   : > { %v2223_v28 = vsel %vm2159_vm5, %v2127_v25, %v2191_v51  ;;  %v2060_v53 = vadd.f32 %v1972_v1, %v1866_v14  ;;  %v1335_v1 = vld [vmem:[#allocation2 + $0x1f2] sm:$0xff] }
 0x27e   : > { %2255 = vst.msk [vmem:[%s3677_s8 + $0x18] sm:$0xff] %vm339_vm0, %v2223_v28  ;;  %2019 = vmatmul.f32.gmra.mxu0 %v1332_v50  ;;  %1442 = vmatmul.f32.gmra.mxu1 %v1333_v11  ;;  %v1674_v24 = vadd.f32 %v1590_v46, %v1479_v0 }
 0x27f   : > { %v2096_v60 = vadd.f32 %v3666_v27, %v2060_v53  ;;  %1828 = vmatmul.f32.gmra.mxu3 %v1721_v42  ;;  %1640 = vmatmul.f32.gmra.mxu2 %v3707_v17 }
 0x281   : > { %v2128_v40 = vmul.f32 1.4142135, %v2096_v60 }
 0x282   : > { %v1781_v45 = vpop.f32.mrf.mxu3  ;;  %v1593_v13 = vpop.f32.mrf.mxu2 }
 0x283   : > { %vm2160_vm6 = vcmp.ge.f32.partialorder %v2128_v40, 0.0  ;;  %v2192_v8 = vmul.f32 0.2, %v2128_v40  ;;  %v1975_v23 = vpop.f32.mrf.mxu0  ;;  %v1867_v54 = vadd.f32 %v1781_v45, %v1673_v19  ;;  %v1398_v29 = vpop.f32.mrf.mxu1 }
 0x284   : > { %v1480_v52 = vadd.f32 %v1398_v29, %v3484_v62  ;;  %v1724_v62 = vld [vmem:[#allocation2 + $0x201] sm:$0xff] }
 0x285   : > { %v2224_v26 = vsel %vm2160_vm6, %v2128_v40, %v2192_v8  ;;  %v2061_v18 = vadd.f32 %v1975_v23, %v1867_v54  ;;  %v1336_v23 = vld [vmem:[#allocation2 + $0x202] sm:$0xff] }
 0x286   : > { %2256 = vst.msk [vmem:[%s3677_s8 + $0x20] sm:$0xff] %vm339_vm0, %v2224_v26  ;;  %2022 = vmatmul.f32.gmra.mxu0 %v1333_v11  ;;  %1445 = vmatmul.f32.gmra.mxu1 %v1334_v35  ;;  %v1675_v46 = vadd.f32 %v1593_v13, %v1480_v52  ;;  %v1532_v13 = vld [vmem:[#allocation2 + $0x220] sm:$0xff] }
 0x287   : > { %v2097_v61 = vadd.f32 %v3666_v27, %v2061_v18  ;;  %1831 = vmatmul.f32.gmra.mxu3 %v1722_v37  ;;  %1643 = vmatmul.f32.gmra.mxu2 %v1530_v44 }
 0x289   : > { %v2129_v2 = vmul.f32 1.4142135, %v2097_v61 }
 0x28a   : > { %v1784_v50 = vpop.f32.mrf.mxu3  ;;  %v1596_v25 = vpop.f32.mrf.mxu2 }
 0x28b   : > { %vm2161_vm7 = vcmp.ge.f32.partialorder %v2129_v2, 0.0  ;;  %v2193_v38 = vmul.f32 0.2, %v2129_v2  ;;  %v1978_v9 = vpop.f32.mrf.mxu0  ;;  %v1868_v34 = vadd.f32 %v1784_v50, %v1674_v24  ;;  %v1401_v30 = vpop.f32.mrf.mxu1 }
 0x28c   : > { %v1481_v54 = vadd.f32 %v1401_v30, %v3496_v4  ;;  %v1725_v4 = vld [vmem:[#allocation2 + $0x211] sm:$0xff] }
 0x28d   : > { %v2225_v16 = vsel %vm2161_vm7, %v2129_v2, %v2193_v38  ;;  %v2062_v51 = vadd.f32 %v1978_v9, %v1868_v34  ;;  %v1337_v38 = vld [vmem:[#allocation2 + $0x212] sm:$0xff] }
 0x28e   : > { %2257 = vst.msk [vmem:[%s3677_s8 + $0x28] sm:$0xff] %vm339_vm0, %v2225_v16  ;;  %2025 = vmatmul.f32.gmra.mxu0 %v1334_v35  ;;  %1448 = vmatmul.f32.gmra.mxu1 %v1335_v1  ;;  %v1676_v26 = vadd.f32 %v1596_v25, %v1481_v54  ;;  %v1533_v30 = vld [vmem:[#allocation2 + $0x230] sm:$0xff] }
 0x28f   : > { %v2098_v14 = vadd.f32 %v3666_v27, %v2062_v51  ;;  %1834 = vmatmul.f32.gmra.mxu3 %v1723_v7  ;;  %1646 = vmatmul.f32.gmra.mxu2 %v1531_v31 }
 0x291   : > { %v2130_v28 = vmul.f32 1.4142135, %v2098_v14 }
 0x292   : > { %v1787_v53 = vpop.f32.mrf.mxu3  ;;  %v1599_v40 = vpop.f32.mrf.mxu2 }
 0x293   : > { %vm2162_vm8 = vcmp.ge.f32.partialorder %v2130_v28, 0.0  ;;  %v2194_v11 = vmul.f32 0.2, %v2130_v28  ;;  %v1981_v42 = vpop.f32.mrf.mxu0  ;;  %v1869_v60 = vadd.f32 %v1787_v53, %v1675_v46  ;;  %v1404_v19 = vpop.f32.mrf.mxu1  ;;  %v1338_v53 = vld [vmem:[#allocation2 + $0x222] sm:$0xff] }
 0x294   : > { %v1482_v9 = vadd.f32 %v1404_v19, %v3505_v12  ;;  %v1726_v12 = vld [vmem:[#allocation2 + $0x221] sm:$0xff] }
 0x295   : > { %v2226_v45 = vsel %vm2162_vm8, %v2130_v28, %v2194_v11  ;;  %v2063_v8 = vadd.f32 %v1981_v42, %v1869_v60 }
 0x296   : > { %2258 = vst.msk [vmem:[%s3677_s8 + $0x30] sm:$0xff] %vm339_vm0, %v2226_v45  ;;  %2028 = vmatmul.f32.gmra.mxu0 %v1917_v41  ;;  %1451 = vmatmul.f32.gmra.mxu1 %v1336_v23  ;;  %v1677_v7 = vadd.f32 %v1599_v40, %v1482_v9  ;;  %v1534_v41 = vld [vmem:[#allocation2 + $0x240] sm:$0xff] }
 0x297   : > { %v2099_v29 = vadd.f32 %v3666_v27, %v2063_v8  ;;  %1837 = vmatmul.f32.gmra.mxu3 %v1724_v62  ;;  %1649 = vmatmul.f32.gmra.mxu2 %v1532_v13 }
 0x299   : > { %v2131_v18 = vmul.f32 1.4142135, %v2099_v29 }
 0x29a   : > { %v1790_v35 = vpop.f32.mrf.mxu3  ;;  %v1602_v24 = vpop.f32.mrf.mxu2 }
 0x29b   : > { %vm2163_vm9 = vcmp.ge.f32.partialorder %v2131_v18, 0.0  ;;  %v2195_v37 = vmul.f32 0.2, %v2131_v18  ;;  %v1984_v0 = vpop.f32.mrf.mxu0  ;;  %v1870_v61 = vadd.f32 %v1790_v35, %v1676_v26  ;;  %v1407_v44 = vpop.f32.mrf.mxu1  ;;  %v1339_v26 = vld [vmem:[#allocation2 + $0x232] sm:$0xff] }
 0x29c   : > { %v1483_v11 = vadd.f32 %v1407_v44, %v3515_v39  ;;  %v1727_v39 = vld [vmem:[#allocation2 + $0x231] sm:$0xff] }
 0x29d   : > { %v2227_v2 = vsel %vm2163_vm9, %v2131_v18, %v2195_v37  ;;  %v2064_v50 = vadd.f32 %v1984_v0, %v1870_v61  ;;  %v1535_v37 = vld [vmem:[#allocation2 + $0x250] sm:$0xff] }
 0x29e   : > { %2259 = vst.msk [vmem:[%s3677_s8 + $0x38] sm:$0xff] %vm339_vm0, %v2227_v2  ;;  %2031 = vmatmul.f32.gmra.mxu0 %v1336_v23  ;;  %1454 = vmatmul.f32.gmra.mxu1 %v1337_v38  ;;  %v1678_v60 = vadd.f32 %v1602_v24, %v1483_v11 }
 0x29f   : > { %v2100_v34 = vadd.f32 %v3666_v27, %v2064_v50  ;;  %1840 = vmatmul.f32.gmra.mxu3 %v1725_v4  ;;  %1652 = vmatmul.f32.gmra.mxu2 %v1533_v30  ;;  %v1340_v30 = vld [vmem:[#allocation2 + $0x242] sm:$0xff] }
 0x2a1   : > { %v2132_v25 = vmul.f32 1.4142135, %v2100_v34 }
 0x2a2   : > { %v1793_v16 = vpop.f32.mrf.mxu3  ;;  %v1605_v31 = vpop.f32.mrf.mxu2 }
 0x2a3   : > { %vm2164_vm10 = vcmp.ge.f32.partialorder %v2132_v25, 0.0  ;;  %v2196_v51 = vmul.f32 0.2, %v2132_v25  ;;  %v1987_v1 = vpop.f32.mrf.mxu0  ;;  %v1871_v52 = vadd.f32 %v1793_v16, %v1677_v7  ;;  %v1410_v14 = vpop.f32.mrf.mxu1  ;;  %v1536_v16 = vld [vmem:[#allocation2 + $0x260] sm:$0xff] }
 0x2a4   : > { %v1484_v18 = vadd.f32 %v1410_v14, %v3525_v59  ;;  %v1728_v59 = vld [vmem:[#allocation2 + $0x241] sm:$0xff] }
 0x2a5   : > { %v2228_v46 = vsel %vm2164_vm10, %v2132_v25, %v2196_v51  ;;  %v2065_v28 = vadd.f32 %v1987_v1, %v1871_v52 }
 0x2a6   : > { %2260 = vst.msk [vmem:[%s3677_s8 + $0x40] sm:$0xff] %vm339_vm0, %v2228_v46  ;;  %2034 = vmatmul.f32.gmra.mxu0 %v1337_v38  ;;  %1457 = vmatmul.f32.gmra.mxu1 %v1338_v53  ;;  %v1679_v0 = vadd.f32 %v1605_v31, %v1484_v18 }
 0x2a7   : > { %v2101_v42 = vadd.f32 %v3666_v27, %v2065_v28  ;;  %1843 = vmatmul.f32.gmra.mxu3 %v1726_v12  ;;  %1655 = vmatmul.f32.gmra.mxu2 %v1534_v41 }
 0x2a9   : > { %v2133_v19 = vmul.f32 1.4142135, %v2101_v42  ;;  %v1341_v42 = vld [vmem:[#allocation2 + $0x252] sm:$0xff] }
 0x2aa   : > { %v1796_v40 = vpop.f32.mrf.mxu3  ;;  %v1608_v54 = vpop.f32.mrf.mxu2 }
 0x2ab   : > { %vm2165_vm11 = vcmp.ge.f32.partialorder %v2133_v19, 0.0  ;;  %v2197_v45 = vmul.f32 0.2, %v2133_v19  ;;  %v1990_v8 = vpop.f32.mrf.mxu0  ;;  %v1872_v23 = vadd.f32 %v1796_v40, %v1678_v60  ;;  %v1413_v62 = vpop.f32.mrf.mxu1 }
 0x2ac   : > { %v1485_v7 = vadd.f32 %v1413_v62, %v3534_v32  ;;  %v1729_v32 = vld [vmem:[#allocation2 + $0x251] sm:$0xff] }
 0x2ad   : > { %v2229_v29 = vsel %vm2165_vm11, %v2133_v19, %v2197_v45  ;;  %v2066_v13 = vadd.f32 %v1990_v8, %v1872_v23 }
 0x2ae   : > { %2261 = vst.msk [vmem:[%s3677_s8 + $0x48] sm:$0xff] %vm339_vm0, %v2229_v29  ;;  %2037 = vmatmul.f32.gmra.mxu0 %v1338_v53  ;;  %1460 = vmatmul.f32.gmra.mxu1 %v1339_v26  ;;  %v1680_v51 = vadd.f32 %v1608_v54, %v1485_v7 }
 0x2af   : > { %v2102_v35 = vadd.f32 %v3666_v27, %v2066_v13  ;;  %1846 = vmatmul.f32.gmra.mxu3 %v1727_v39  ;;  %1658 = vmatmul.f32.gmra.mxu2 %v1535_v37  ;;  %v1342_v39 = vld [vmem:[#allocation2 + $0x262] sm:$0xff] }
 0x2b1   : > { %v2134_v61 = vmul.f32 1.4142135, %v2102_v35 }
 0x2b2   : > { %v1799_v44 = vpop.f32.mrf.mxu3  ;;  %v1611_v4 = vpop.f32.mrf.mxu2 }
 0x2b3   : > { %vm2166_vm12 = vcmp.ge.f32.partialorder %v2134_v61, 0.0  ;;  %v2198_v24 = vmul.f32 0.2, %v2134_v61  ;;  %v1993_v2 = vpop.f32.mrf.mxu0  ;;  %v1873_v50 = vadd.f32 %v1799_v44, %v1679_v0  ;;  %v1416_v38 = vpop.f32.mrf.mxu1 }
 0x2b4   : > { %v1486_v41 = vadd.f32 %v1416_v38, %v3541_v48  ;;  %v1730_v48 = vld [vmem:[#allocation2 + $0x261] sm:$0xff] }
 0x2b5   : > { %v2230_v9 = vsel %vm2166_vm12, %v2134_v61, %v2198_v24  ;;  %v2067_v34 = vadd.f32 %v1993_v2, %v1873_v50  ;;  %v1731_v50 = vld [vmem:[#allocation2 + $0x271] sm:$0xff] }
 0x2b6   : > { %2262 = vst.msk [vmem:[%s3677_s8 + $0x50] sm:$0xff] %vm339_vm0, %v2230_v9  ;;  %2040 = vmatmul.f32.gmra.mxu0 %v1339_v26  ;;  %1463 = vmatmul.f32.gmra.mxu1 %v1340_v30  ;;  %v1681_v19 = vadd.f32 %v1611_v4, %v1486_v41 }
 0x2b7   : > { %v2103_v25 = vadd.f32 %v3666_v27, %v2067_v34  ;;  %1849 = vmatmul.f32.gmra.mxu3 %v1728_v59  ;;  %1661 = vmatmul.f32.gmra.mxu2 %v1536_v16 }
 0x2b9   : > { %v2135_v1 = vmul.f32 1.4142135, %v2103_v25 }
 0x2ba   : > { %v1802_v52 = vpop.f32.mrf.mxu3  ;;  %v1614_v53 = vpop.f32.mrf.mxu2 }
 0x2bb   : > { %vm2167_vm13 = vcmp.ge.f32.partialorder %v2135_v1, 0.0  ;;  %v2199_v14 = vmul.f32 0.2, %v2135_v1  ;;  %v1996_v31 = vpop.f32.mrf.mxu0  ;;  %v1874_v46 = vadd.f32 %v1802_v52, %v1680_v51  ;;  %v1419_v28 = vpop.f32.mrf.mxu1  ;;  %v1925_v52 = vld [vmem:[#allocation2 + $0x272] sm:$0xff] }
 0x2bc   : > { %v1487_v18 = vadd.f32 %v1419_v28, %v3550_v49 }
 0x2bd   : > { %v2231_v12 = vsel %vm2167_vm13, %v2135_v1, %v2199_v14  ;;  %v2068_v11 = vadd.f32 %v1996_v31, %v1874_v46 }
 0x2be   : > { %2263 = vst.msk [vmem:[%s3677_s8 + $0x58] sm:$0xff] %vm339_vm0, %v2231_v12  ;;  %2043 = vmatmul.f32.gmra.mxu0 %v1340_v30  ;;  %1466 = vmatmul.f32.gmra.mxu1 %v1341_v42  ;;  %v1682_v35 = vadd.f32 %v1614_v53, %v1487_v18 }
 0x2bf   : > { %v2104_v60 = vadd.f32 %v3666_v27, %v2068_v11  ;;  %1852 = vmatmul.f32.gmra.mxu3 %v1729_v32  ;;  %1664 = vmatmul.f32.gmra.mxu2 %v3707_v17 }
 0x2c1   : > { %v2136_v40 = vmul.f32 1.4142135, %v2104_v60 }
 0x2c2   : > { %v1805_v45 = vpop.f32.mrf.mxu3  ;;  %v1617_v29 = vpop.f32.mrf.mxu2 }
 0x2c3   : > { %vm2168_vm14 = vcmp.ge.f32.partialorder %v2136_v40, 0.0  ;;  %v2200_v8 = vmul.f32 0.2, %v2136_v40  ;;  %v1999_v23 = vpop.f32.mrf.mxu0  ;;  %v1875_v62 = vadd.f32 %v1805_v45, %v1681_v19  ;;  %v1422_v54 = vpop.f32.mrf.mxu1 }
 0x2c4   : > { %v1488_v49 = vadd.f32 %v1422_v54, %v3559_v47 }
 0x2c5   : > { %v2232_v13 = vsel %vm2168_vm14, %v2136_v40, %v2200_v8  ;;  %v2069_v26 = vadd.f32 %v1999_v23, %v1875_v62 }
 0x2c6   : > { %2264 = vst.msk [vmem:[%s3677_s8 + $0x60] sm:$0xff] %vm339_vm0, %v2232_v13  ;;  %2046 = vmatmul.f32.gmra.mxu0 %v1341_v42  ;;  %1469 = vmatmul.f32.gmra.mxu1 %v1342_v39  ;;  %v1683_v30 = vadd.f32 %v1617_v29, %v1488_v49 }
 0x2c7   : > { %v2105_v17 = vadd.f32 %v3666_v27, %v2069_v26  ;;  %1855 = vmatmul.f32.gmra.mxu3 %v1730_v48 }
 0x2c9   : > { %v2137_v37 = vmul.f32 1.4142135, %v2105_v17 }
 0x2ca   : > { %v1808_v0 = vpop.f32.mrf.mxu3  ;;  %v1620_v38 = vpop.f32.mrf.mxu2 }
 0x2cb   : > { %vm2169_vm15 = vcmp.ge.f32.partialorder %v2137_v37, 0.0  ;;  %v2201_v61 = vmul.f32 0.2, %v2137_v37  ;;  %v2002_v44 = vpop.f32.mrf.mxu0  ;;  %v1876_v24 = vadd.f32 %v1808_v0, %v1682_v35  ;;  %v1425_v2 = vpop.f32.mrf.mxu1 }
 0x2cc   : > { %v1489_v47 = vadd.f32 %v1425_v2, %v3568_v22 }
 0x2cd   : > { %v2233_v4 = vsel %vm2169_vm15, %v2137_v37, %v2201_v61  ;;  %v2070_v9 = vadd.f32 %v2002_v44, %v1876_v24 }
 0x2ce   : > { %2265 = vst.msk [vmem:[%s3677_s8 + $0x68] sm:$0xff] %vm339_vm0, %v2233_v4  ;;  %2049 = vmatmul.f32.gmra.mxu0 %v1342_v39  ;;  %v1684_v53 = vadd.f32 %v1620_v38, %v1489_v47 }
 0x2cf   : > { %v2106_v34 = vadd.f32 %v3666_v27, %v2070_v9  ;;  %1858 = vmatmul.f32.gmra.mxu3 %v1731_v50 }
 0x2d1   : > { %v2138_v59 = vmul.f32 1.4142135, %v2106_v34 }
 0x2d2   : > { %v1811_v7 = vpop.f32.mrf.mxu3  ;;  %v1623_v14 = vpop.f32.mrf.mxu2 }
 0x2d3   : > { %vm2170_vm1 = vcmp.ge.f32.partialorder %v2138_v59, 0.0  ;;  %v2202_v25 = vmul.f32 0.2, %v2138_v59  ;;  %v2005_v16 = vpop.f32.mrf.mxu0  ;;  %v1877_v51 = vadd.f32 %v1811_v7, %v1683_v30  ;;  %v1428_v1 = vpop.f32.mrf.mxu1 }
 0x2d4   : > { %v1490_v8 = vadd.f32 %v1428_v1, %v3577_v5 }
 0x2d5   : > { %v2234_v31 = vsel %vm2170_vm1, %v2138_v59, %v2202_v25  ;;  %v2071_v46 = vadd.f32 %v2005_v16, %v1877_v51 }
 0x2d6   : > { %2266 = vst.msk [vmem:[%s3677_s8 + $0x70] sm:$0xff] %vm339_vm0, %v2234_v31  ;;  %2052 = vmatmul.f32.gmra.mxu0 %v1925_v52  ;;  %v1685_v23 = vadd.f32 %v1623_v14, %v1490_v8 }
 0x2d7   : > { %v2107_v28 = vadd.f32 %v3666_v27, %v2071_v46 }
 0x2d9   : > { %v2139_v12 = vmul.f32 1.4142135, %v2107_v28 }
 0x2da   : > { %v1814_v11 = vpop.f32.mrf.mxu3  ;;  %v1626_v19 = vpop.f32.mrf.mxu2 }
 0x2db   : > { %vm2171_vm2 = vcmp.ge.f32.partialorder %v2139_v12, 0.0  ;;  %v2203_v42 = vmul.f32 0.2, %v2139_v12  ;;  %v2008_v32 = vpop.f32.mrf.mxu0  ;;  %v1878_v41 = vadd.f32 %v1814_v11, %v1684_v53  ;;  %v1431_v60 = vpop.f32.mrf.mxu1 }
 0x2dc   : > { %v1491_v35 = vadd.f32 %v1431_v60, %v3586_v63 }
 0x2dd   : > { %v2235_v40 = vsel %vm2171_vm2, %v2139_v12, %v2203_v42  ;;  %v2072_v45 = vadd.f32 %v2008_v32, %v1878_v41 }
 0x2de   : > { %2267 = vst.msk [vmem:[%s3677_s8 + $0x78] sm:$0xff] %vm339_vm0, %v2235_v40  ;;  %v1686_v37 = vadd.f32 %v1626_v19, %v1491_v35 }
 0x2df   : > { %v2108_v22 = vadd.f32 %v3666_v27, %v2072_v45 }
 0x2e1   : > { %v2140_v62 = vmul.f32 1.4142135, %v2108_v22 }
 0x2e2   : > { %v1817_v54 = vpop.f32.mrf.mxu3  ;;  %v1629_v48 = vpop.f32.mrf.mxu2 }
 0x2e3   : > { %vm2172_vm3 = vcmp.ge.f32.partialorder %v2140_v62, 0.0  ;;  %v2204_v29 = vmul.f32 0.2, %v2140_v62  ;;  %v2011_v13 = vpop.f32.mrf.mxu0  ;;  %v1879_v26 = vadd.f32 %v1817_v54, %v1685_v23  ;;  %v1434_v39 = vpop.f32.mrf.mxu1 }
 0x2e4   : > { %v1492_v49 = vadd.f32 %v1434_v39, %v3595_v10 }
 0x2e5   : > { %v2236_v18 = vsel %vm2172_vm3, %v2140_v62, %v2204_v29  ;;  %v2073_v17 = vadd.f32 %v2011_v13, %v1879_v26 }
 0x2e6   : > { %2268 = vst.msk [vmem:[%s3677_s8 + $0x80] sm:$0xff] %vm339_vm0, %v2236_v18  ;;  %v1687_v34 = vadd.f32 %v1629_v48, %v1492_v49 }
 0x2e7   : > { %v2109_v5 = vadd.f32 %v3666_v27, %v2073_v17 }
 0x2e9   : > { %v2141_v0 = vmul.f32 1.4142135, %v2109_v5 }
 0x2ea   : > { %v1820_v61 = vpop.f32.mrf.mxu3  ;;  %v1632_v38 = vpop.f32.mrf.mxu2 }
 0x2eb   : > { %vm2173_vm4 = vcmp.ge.f32.partialorder %v2141_v0, 0.0  ;;  %v2205_v44 = vmul.f32 0.2, %v2141_v0  ;;  %v2014_v24 = vpop.f32.mrf.mxu0  ;;  %v1880_v2 = vadd.f32 %v1820_v61, %v1686_v37  ;;  %v1437_v50 = vpop.f32.mrf.mxu1 }
 0x2ec   : > { %v1493_v31 = vadd.f32 %v1437_v50, %v3604_v36 }
 0x2ed   : > { %v2237_v4 = vsel %vm2173_vm4, %v2141_v0, %v2205_v44  ;;  %v2074_v9 = vadd.f32 %v2014_v24, %v1880_v2 }
 0x2ee   : > { %2269 = vst.msk [vmem:[%s3677_s8 + $0x88] sm:$0xff] %vm339_vm0, %v2237_v4  ;;  %v1688_v46 = vadd.f32 %v1632_v38, %v1493_v31 }
 0x2ef   : > { %v2110_v63 = vadd.f32 %v3666_v27, %v2074_v9 }
 0x2f1   : > { %v2142_v30 = vmul.f32 1.4142135, %v2110_v63 }
 0x2f2   : > { %v1823_v59 = vpop.f32.mrf.mxu3  ;;  %v1635_v1 = vpop.f32.mrf.mxu2 }
 0x2f3   : > { %vm2174_vm5 = vcmp.ge.f32.partialorder %v2142_v30, 0.0  ;;  %v2206_v7 = vmul.f32 0.2, %v2142_v30  ;;  %v2017_v25 = vpop.f32.mrf.mxu0  ;;  %v1881_v16 = vadd.f32 %v1823_v59, %v1687_v34  ;;  %v1440_v51 = vpop.f32.mrf.mxu1 }
 0x2f4   : > { %v1494_v19 = vadd.f32 %v1440_v51, %v3611_v43 }
 0x2f5   : > { %v2238_v52 = vsel %vm2174_vm5, %v2142_v30, %v2206_v7  ;;  %v2075_v14 = vadd.f32 %v2017_v25, %v1881_v16 }
 0x2f6   : > { %2270 = vst.msk [vmem:[%s3677_s8 + $0x90] sm:$0xff] %vm339_vm0, %v2238_v52  ;;  %v1689_v40 = vadd.f32 %v1635_v1, %v1494_v19 }
 0x2f7   : > { %v2111_v10 = vadd.f32 %v3666_v27, %v2075_v14 }
 0x2f9   : > { %v2143_v47 = vmul.f32 1.4142135, %v2111_v10 }
 0x2fa   : > { %v1826_v28 = vpop.f32.mrf.mxu3  ;;  %v1638_v32 = vpop.f32.mrf.mxu2 }
 0x2fb   : > { %vm2175_vm6 = vcmp.ge.f32.partialorder %v2143_v47, 0.0  ;;  %v2207_v53 = vmul.f32 0.2, %v2143_v47  ;;  %v2020_v12 = vpop.f32.mrf.mxu0  ;;  %v1882_v11 = vadd.f32 %v1826_v28, %v1688_v46  ;;  %v1443_v42 = vpop.f32.mrf.mxu1 }
 0x2fc   : > { %v1495_v39 = vadd.f32 %v1443_v42, %v3618_v56 }
 0x2fd   : > { %v2239_v41 = vsel %vm2175_vm6, %v2143_v47, %v2207_v53  ;;  %v2076_v60 = vadd.f32 %v2020_v12, %v1882_v11 }
 0x2fe   : > { %2271 = vst.msk [vmem:[%s3677_s8 + $0x98] sm:$0xff] %vm339_vm0, %v2239_v41  ;;  %v1690_v48 = vadd.f32 %v1638_v32, %v1495_v39 }
 0x2ff   : > { %v2112_v36 = vadd.f32 %v3666_v27, %v2076_v60 }
 0x301   : > { %v2144_v45 = vmul.f32 1.4142135, %v2112_v36 }
 0x302   : > { %v1829_v8 = vpop.f32.mrf.mxu3  ;;  %v1641_v29 = vpop.f32.mrf.mxu2 }
 0x303   : > { %vm2176_vm7 = vcmp.ge.f32.partialorder %v2144_v45, 0.0  ;;  %v2208_v22 = vmul.f32 0.2, %v2144_v45  ;;  %v2023_v23 = vpop.f32.mrf.mxu0  ;;  %v1883_v62 = vadd.f32 %v1829_v8, %v1689_v40  ;;  %v1446_v54 = vpop.f32.mrf.mxu1 }
 0x304   : > { %v1496_v2 = vadd.f32 %v1446_v54, %v3623_v58 }
 0x305   : > { %v2240_v13 = vsel %vm2176_vm7, %v2144_v45, %v2208_v22  ;;  %v2077_v26 = vadd.f32 %v2023_v23, %v1883_v62 }
 0x306   : > { %2272 = vst.msk [vmem:[%s3677_s8 + $0xa0] sm:$0xff] %vm339_vm0, %v2240_v13  ;;  %v1691_v50 = vadd.f32 %v1641_v29, %v1496_v2 }
 0x307   : > { %v2113_v43 = vadd.f32 %v3666_v27, %v2077_v26 }
 0x309   : > { %v2145_v18 = vmul.f32 1.4142135, %v2113_v43 }
 0x30a   : > { %v1832_v17 = vpop.f32.mrf.mxu3  ;;  %v1644_v61 = vpop.f32.mrf.mxu2 }
 0x30b   : > { %vm2177_vm8 = vcmp.ge.f32.partialorder %v2145_v18, 0.0  ;;  %v2209_v35 = vmul.f32 0.2, %v2145_v18  ;;  %v2026_v5 = vpop.f32.mrf.mxu0  ;;  %v1884_v37 = vadd.f32 %v1832_v17, %v1690_v48  ;;  %v1449_v0 = vpop.f32.mrf.mxu1 }
 0x30c   : > { %v1497_v25 = vadd.f32 %v1449_v0, %v3632_v21 }
 0x30d   : > { %v2241_v44 = vsel %vm2177_vm8, %v2145_v18, %v2209_v35  ;;  %v2078_v24 = vadd.f32 %v2026_v5, %v1884_v37 }
 0x30e   : > { %2273 = vst.msk [vmem:[%s3677_s8 + $0xa8] sm:$0xff] %vm339_vm0, %v2241_v44  ;;  %v1692_v16 = vadd.f32 %v1644_v61, %v1497_v25 }
 0x30f   : > { %v2114_v56 = vadd.f32 %v3666_v27, %v2078_v24 }
 0x311   : > { %v2146_v38 = vmul.f32 1.4142135, %v2114_v56 }
 0x312   : > { %v1835_v4 = vpop.f32.mrf.mxu3  ;;  %v1647_v30 = vpop.f32.mrf.mxu2 }
 0x313   : > { %vm2178_vm9 = vcmp.ge.f32.partialorder %v2146_v38, 0.0  ;;  %v2210_v9 = vmul.f32 0.2, %v2146_v38  ;;  %v2029_v49 = vpop.f32.mrf.mxu0  ;;  %v1885_v63 = vadd.f32 %v1835_v4, %v1691_v50  ;;  %v1452_v34 = vpop.f32.mrf.mxu1 }
 0x314   : > { %v1498_v53 = vadd.f32 %v1452_v34, %v3641_v20 }
 0x315   : > { %v2242_v59 = vsel %vm2178_vm9, %v2146_v38, %v2210_v9  ;;  %v2079_v7 = vadd.f32 %v2029_v49, %v1885_v63 }
 0x316   : > { %2274 = vst.msk [vmem:[%s3677_s8 + $0xb0] sm:$0xff] %vm339_vm0, %v2242_v59  ;;  %v1693_v12 = vadd.f32 %v1647_v30, %v1498_v53 }
 0x317   : > { %v2115_v58 = vadd.f32 %v3666_v27, %v2079_v7 }
 0x319   : > { %v2147_v51 = vmul.f32 1.4142135, %v2115_v58 }
 0x31a   : > { %v1838_v1 = vpop.f32.mrf.mxu3  ;;  %v1650_v46 = vpop.f32.mrf.mxu2 }
 0x31b   : > { %vm2179_vm10 = vcmp.ge.f32.partialorder %v2147_v51, 0.0  ;;  %v2211_v52 = vmul.f32 0.2, %v2147_v51  ;;  %v2032_v14 = vpop.f32.mrf.mxu0  ;;  %v1886_v31 = vadd.f32 %v1838_v1, %v1692_v16  ;;  %v1455_v10 = vpop.f32.mrf.mxu1 }
 0x31c   : > { %v1499_v8 = vadd.f32 %v1455_v10, %v3650_v33 }
 0x31d   : > { %v2243_v47 = vsel %vm2179_vm10, %v2147_v51, %v2211_v52  ;;  %v2080_v28 = vadd.f32 %v2032_v14, %v1886_v31 }
 0x31e   : > { %2275 = vst.msk [vmem:[%s3677_s8 + $0xb8] sm:$0xff] %vm339_vm0, %v2243_v47  ;;  %v1694_v22 = vadd.f32 %v1650_v46, %v1499_v8 }
 0x31f   : > { %v2116_v21 = vadd.f32 %v3666_v27, %v2080_v28 }
 0x321   : > { %v2148_v11 = vmul.f32 1.4142135, %v2116_v21 }
 0x322   : > { %v1841_v42 = vpop.f32.mrf.mxu3  ;;  %v1653_v45 = vpop.f32.mrf.mxu2 }
 0x323   : > { %vm2180_vm11 = vcmp.ge.f32.partialorder %v2148_v11, 0.0  ;;  %v2212_v32 = vmul.f32 0.2, %v2148_v11  ;;  %v2035_v41 = vpop.f32.mrf.mxu0  ;;  %v1887_v60 = vadd.f32 %v1841_v42, %v1693_v12  ;;  %v1458_v19 = vpop.f32.mrf.mxu1 }
 0x324   : > { %v1500_v48 = vadd.f32 %v1458_v19, %v3658_v57 }
 0x325   : > { %v2244_v36 = vsel %vm2180_vm11, %v2148_v11, %v2212_v32  ;;  %v2081_v40 = vadd.f32 %v2035_v41, %v1887_v60 }
 0x326   : > { %2276 = vst.msk [vmem:[%s3677_s8 + $0xc0] sm:$0xff] %vm339_vm0, %v2244_v36  ;;  %v1695_v17 = vadd.f32 %v1653_v45, %v1500_v48 }
 0x327   : > { %v2117_v20 = vadd.f32 %v3666_v27, %v2081_v40 }
 0x329   : > { %v2149_v23 = vmul.f32 1.4142135, %v2117_v20 }
 0x32a   : > { %v1844_v62 = vpop.f32.mrf.mxu3  ;;  %v1656_v33 = vpop.f32.mrf.mxu2 }
 0x32b   : > { %vm2181_vm12 = vcmp.ge.f32.partialorder %v2149_v23, 0.0  ;;  %v2213_v54 = vmul.f32 0.2, %v2149_v23  ;;  %v2038_v29 = vpop.f32.mrf.mxu0  ;;  %v1888_v13 = vadd.f32 %v1844_v62, %v1694_v22  ;;  %v1461_v43 = vpop.f32.mrf.mxu1 }
 0x32c   : > { %v1501_v2 = vadd.f32 %v1461_v43, %v3670_v6 }
 0x32d   : > { %v2245_v26 = vsel %vm2181_vm12, %v2149_v23, %v2213_v54  ;;  %v2082_v39 = vadd.f32 %v2038_v29, %v1888_v13 }
 0x32e   : > { %2277 = vst.msk [vmem:[%s3677_s8 + $0xc8] sm:$0xff] %vm339_vm0, %v2245_v26  ;;  %v1696_v50 = vadd.f32 %v1656_v33, %v1501_v2 }
 0x32f   : > { %v2118_v18 = vadd.f32 %v3666_v27, %v2082_v39 }
 0x331   : > { %v2150_v35 = vmul.f32 1.4142135, %v2118_v18 }
 0x332   : > { %v1847_v5 = vpop.f32.mrf.mxu3  ;;  %v1659_v4 = vpop.f32.mrf.mxu2 }
 0x333   : > { %vm2182_vm13 = vcmp.ge.f32.partialorder %v2150_v35, 0.0  ;;  %v2214_v37 = vmul.f32 0.2, %v2150_v35  ;;  %v2041_v0 = vpop.f32.mrf.mxu0  ;;  %v1889_v61 = vadd.f32 %v1847_v5, %v1695_v17  ;;  %v1464_v57 = vpop.f32.mrf.mxu1 }
 0x334   : > { %v1502_v7 = vadd.f32 %v1464_v57, %v3681_v3 }
 0x335   : > { %v2246_v44 = vsel %vm2182_vm13, %v2150_v35, %v2214_v37  ;;  %v2083_v24 = vadd.f32 %v2041_v0, %v1889_v61 }
 0x336   : > { %2278 = vst.msk [vmem:[%s3677_s8 + $0xd0] sm:$0xff] %vm339_vm0, %v2246_v44  ;;  %v1697_v25 = vadd.f32 %v1659_v4, %v1502_v7 }
 0x337   : > { %v2119_v56 = vadd.f32 %v3666_v27, %v2083_v24 }
 0x339   : > { %v2151_v38 = vmul.f32 1.4142135, %v2119_v56 }
 0x33a   : > { %v1850_v9 = vpop.f32.mrf.mxu3  ;;  %v1662_v31 = vpop.f32.mrf.mxu2 }
 0x33b   : > { %vm2183_vm14 = vcmp.ge.f32.partialorder %v2151_v38, 0.0  ;;  %v2215_v49 = vmul.f32 0.2, %v2151_v38  ;;  %v2044_v63 = vpop.f32.mrf.mxu0  ;;  %v1890_v34 = vadd.f32 %v1850_v9, %v1696_v50  ;;  %v1467_v16 = vpop.f32.mrf.mxu1 }
 0x33c   : > { %v1503_v47 = vadd.f32 %v1467_v16, %v3689_v15 }
 0x33d   : > { %v2247_v30 = vsel %vm2183_vm14, %v2151_v38, %v2215_v49  ;;  %v2084_v59 = vadd.f32 %v2044_v63, %v1890_v34 }
 0x33e   : > { %2279 = vst.msk [vmem:[%s3677_s8 + $0xd8] sm:$0xff] %vm339_vm0, %v2247_v30  ;;  %v1698_v28 = vadd.f32 %v1662_v31, %v1503_v47 }
 0x33f   : > { %v2120_v6 = vadd.f32 %v3666_v27, %v2084_v59  ;;  %v2545_v27 = vld [vmem:[%s3826_s3] ss:$0 sm:$0xff] }
 0x341   : > { %v2152_v58 = vmul.f32 1.4142135, %v2120_v6 }
 0x342   : > { %v1853_v51 = vpop.f32.mrf.mxu3  ;;  %v1665_v19 = vpop.f32.mrf.mxu2 }
 0x343   : > { %vm2184_vm15 = vcmp.ge.f32.partialorder %v2152_v58, 0.0  ;;  %v2216_v1 = vmul.f32 0.2, %v2152_v58  ;;  %v2047_v52 = vpop.f32.mrf.mxu0  ;;  %v1891_v14 = vadd.f32 %v1853_v51, %v1697_v25  ;;  %v1470_v32 = vpop.f32.mrf.mxu1 }
 0x344   : > { %v1504_v15 = vadd.f32 %v1470_v32, %v3697_v55 }
 0x345   : > { %v2248_v10 = vsel %vm2184_vm15, %v2152_v58, %v2216_v1  ;;  %v2085_v46 = vadd.f32 %v2047_v52, %v1891_v14 }
 0x346   : > { %2280 = vst.msk [vmem:[%s3677_s8 + $0xe0] sm:$0xff] %vm339_vm0, %v2248_v10  ;;  %v1699_v40 = vadd.f32 %v1665_v19, %v1504_v15 }
 0x347   : > { %v2121_v3 = vadd.f32 %v2545_v27, %v2085_v46 }
 0x349   : > { %v2153_v53 = vmul.f32 1.4142135, %v2121_v3 }
 0x34a   : > { %v1856_v21 = vpop.f32.mrf.mxu3 }
 0x34b   : > { %vm2185_vm1 = vcmp.ge.f32.partialorder %v2153_v53, 0.0  ;;  %v2217_v12 = vmul.f32 0.2, %v2153_v53  ;;  %v2050_v11 = vpop.f32.mrf.mxu0  ;;  %v1892_v42 = vadd.f32 %v1856_v21, %v1698_v28 }
 0x34d   : > { %v2249_v41 = vsel %vm2185_vm1, %v2153_v53, %v2217_v12  ;;  %v2086_v60 = vadd.f32 %v2050_v11, %v1892_v42 }
 0x34e   : > { %2281 = vst.msk [vmem:[%s3677_s8 + $0xe8] sm:$0xff] %vm339_vm0, %v2249_v41 }
 0x34f   : > { %v2122_v36 = vadd.f32 %v2545_v27, %v2086_v60 }
 0x351   : > { %v2154_v45 = vmul.f32 1.4142135, %v2122_v36 }
 0x352   : > { %v1859_v8 = vpop.f32.mrf.mxu3 }
 0x353   : > { %vm2186_vm2 = vcmp.ge.f32.partialorder %v2154_v45, 0.0  ;;  %v2218_v20 = vmul.f32 0.2, %v2154_v45  ;;  %v1893_v22 = vadd.f32 %v1859_v8, %v1699_v40  ;;  %v2053_v23 = vpop.f32.mrf.mxu0 }
 0x355   : > { %v2250_v62 = vsel %vm2186_vm2, %v2154_v45, %v2218_v20  ;;  %v2087_v54 = vadd.f32 %v2053_v23, %v1893_v22 }
 0x356   : > { %2282 = vst.msk [vmem:[%s3677_s8 + $0xf0] sm:$0xff] %vm339_vm0, %v2250_v62 }
 0x357   : > { %v2123_v29 = vadd.f32 %v2545_v27, %v2087_v54 }
 0x359   : > { %v2155_v13 = vmul.f32 1.4142135, %v2123_v29 }
 0x35b   : > { %vm2187_vm3 = vcmp.ge.f32.partialorder %v2155_v13, 0.0  ;;  %v2219_v26 = vmul.f32 0.2, %v2155_v13 }
 0x35d   : > { %v2251_v39 = vsel %vm2187_vm3, %v2155_v13, %v2219_v26 }
 0x35e   : > { %2283 = vst.msk [vmem:[%s3677_s8 + $0xf8] sm:$0xff] %vm339_vm0, %v2251_v39 }
 0x35f PF: > { %s14_s15 = sadd.s32 1, %s2552_s15  }
 0x360   : > { %p11_p5 = scmp.ge.s32.totalorder %s14_s15, 4  }
 0x362   :  { %13 = sbr.rel (!%p11_p5) target bundleno = 1 (0x1), region = 77 }

</bundles_post_ra>
